<compile_context>
chip_gen: v5e
topology: v5e:2x2
jax: 0.10.0
libtpu: 0.0.40
codegen_flags: <defaults>
</compile_context>

<pallas_src>
import functools

import jax
import jax.numpy as jnp
from jax import lax
from jax.experimental import pallas as pl
from jax.experimental.pallas import tpu as pltpu


CFG = dict(
    patch=14, img=28, in_chans=3,
    dim=32, heads=2, depth=2, mlp_ratio=4,
    output_dim=16,
)


# ------------------------------ fused kernel ------------------------------

def _encoder_kernel(
    patches_ref, base_ref, patch_w_ref, mask_ref,
    qkvw_ref, projw_ref, fc1w_ref, fc2w_ref, bias_ref,
    fcw_ref, fcb_ref,
    out_ref,
    *, depth, heads, eps,
):
    f32 = jnp.float32
    bf16 = jnp.bfloat16
    M, D = base_ref.shape
    hd = D // heads
    scale = hd ** -0.5

    def ln_core(x):  # LayerNorm; affine (g,b) folded into the following weights
        mu = jnp.mean(x, axis=-1, keepdims=True)
        var = jnp.mean(jnp.square(x - mu), axis=-1, keepdims=True)
        return (x - mu) * lax.rsqrt(var + eps)

    def gelu(y):  # exact erf GELU (torch nn.GELU default), f32 on the VPU/EUP
        return 0.5 * y * (1.0 + lax.erf(y * 0.7071067811865476))

    # ---- patch embedding (MXU).  cls / pos / patch bias are pre-baked into `base`;
    #      padded token rows and padded K columns are zero, so x is exact. ----
    tok = jnp.dot(patches_ref[...], patch_w_ref[...], preferred_element_type=f32)
    x = base_ref[...] + tok                            # (M, D) f32 residual stream
    mask = mask_ref[...]                               # (M, M) additive attention bias

    for d in range(depth):
        b = bias_ref[d]                                # (4, hidden) packed bias slab
        # ---- attention branch:  x += attn(norm1(x)) @ (proj_w*ls1) + proj_b*ls1 ----
        y = ln_core(x).astype(bf16)
        qkv = jnp.dot(y, qkvw_ref[d], preferred_element_type=f32) + b[0:1, :3 * D]
        proj_w = projw_ref[d]                          # (D, D) bf16, LayerScale folded
        attn_out = jnp.zeros((M, D), f32)
        for h in range(heads):                         # in-register head split
            q = (qkv[:, h * hd:(h + 1) * hd] * scale).astype(bf16)
            k = qkv[:, D + h * hd:D + (h + 1) * hd].astype(bf16)
            v = qkv[:, 2 * D + h * hd:2 * D + (h + 1) * hd].astype(bf16)
            s = lax.dot_general(q, k, (((1,), (1,)), ((), ())),
                                preferred_element_type=f32) + mask
            s = s - jnp.max(s, axis=-1, keepdims=True)
            p = jnp.exp(s)
            p = p * pl.reciprocal(jnp.sum(p, axis=-1, keepdims=True), approx=True)
            o_h = jnp.dot(p.astype(bf16), v, preferred_element_type=f32)
            # concat-free head merge: concat_h(o_h) @ W == sum_h o_h @ W[h-rows]
            attn_out = attn_out + jnp.dot(o_h.astype(bf16),
                                          proj_w[h * hd:(h + 1) * hd, :],
                                          preferred_element_type=f32)
        x = x + attn_out + b[1:2, :D]

        # ---- MLP branch:  x += gelu(norm2(x) @ fc1) @ (fc2*ls2) + fc2_b*ls2 ----
        y = ln_core(x).astype(bf16)
        h1 = gelu(jnp.dot(y, fc1w_ref[d], preferred_element_type=f32) + b[2:3, :])
        h2 = jnp.dot(h1.astype(bf16), fc2w_ref[d], preferred_element_type=f32) + b[3:4, :D]
        x = x + h2

    # ---- final norm (affine folded into fc) + head; wrapper picks the cls rows ----
    xn = ln_core(x).astype(bf16)
    out = jnp.dot(xn, fcw_ref[...], preferred_element_type=f32) + fcb_ref[...]
    out_ref[...] = out.astype(out_ref.dtype)


# ------------------------------ params / wrapper ------------------------------

def init_params(key, cfg):
    D = cfg["dim"]
    P = cfg["patch"]
    C = cfg["in_chans"]
    hidden = cfg["mlp_ratio"] * D
    npatch = (cfg["img"] // P) ** 2

    def nrm(k, shape, std=0.02):
        return std * jax.random.normal(k, shape, dtype=jnp.float32)

    keys = iter(jax.random.split(key, 64))
    params = {
        # Conv2d(C, D, kernel=P, stride=P) expressed as a (C*P*P, D) matmul.
        "patch_w": nrm(next(keys), (C * P * P, D)),
        "patch_b": jnp.zeros((D,), jnp.float32),
        "cls_token": nrm(next(keys), (1, 1, D)),
        "pos_embed": nrm(next(keys), (1, 1 + npatch, D)),
        "norm_g": jnp.ones((D,), jnp.float32),
        "norm_b": jnp.zeros((D,), jnp.float32),
        "fc_w": nrm(next(keys), (D, cfg["output_dim"])),
        "fc_b": jnp.zeros((cfg["output_dim"],), jnp.float32),
        "blocks": [],
    }
    for _ in range(cfg["depth"]):
        params["blocks"].append({
            "norm1_g": jnp.ones((D,), jnp.float32),
            "norm1_b": jnp.zeros((D,), jnp.float32),
            "qkv_w": nrm(next(keys), (D, 3 * D)),
            "qkv_b": jnp.zeros((3 * D,), jnp.float32),
            "proj_w": nrm(next(keys), (D, D)),
            "proj_b": jnp.zeros((D,), jnp.float32),
            "ls1": jnp.ones((D,), jnp.float32),      # LayerScale
            "norm2_g": jnp.ones((D,), jnp.float32),
            "norm2_b": jnp.zeros((D,), jnp.float32),
            "fc1_w": nrm(next(keys), (D, hidden)),
            "fc1_b": jnp.zeros((hidden,), jnp.float32),
            "fc2_w": nrm(next(keys), (hidden, D)),
            "fc2_b": jnp.zeros((D,), jnp.float32),
            "ls2": jnp.ones((D,), jnp.float32),
        })
    return params


def _fold_block(blk):
    """Fold LayerNorm affine params and LayerScale into the adjacent linear weights."""
    qkv_w = blk["norm1_g"][:, None] * blk["qkv_w"]
    qkv_b = blk["norm1_b"] @ blk["qkv_w"] + blk["qkv_b"]
    proj_w = blk["proj_w"] * blk["ls1"][None, :]
    proj_b = blk["proj_b"] * blk["ls1"]
    fc1_w = blk["norm2_g"][:, None] * blk["fc1_w"]
    fc1_b = blk["norm2_b"] @ blk["fc1_w"] + blk["fc1_b"]
    fc2_w = blk["fc2_w"] * blk["ls2"][None, :]
    fc2_b = blk["fc2_b"] * blk["ls2"]
    return qkv_w, proj_w, fc1_w, fc2_w, qkv_b, proj_b, fc1_b, fc2_b


def image_encoder_forward(params, x, cfg):
    """ImageEncoder.forward: DINOv2 forward_features -> x_norm_clstoken -> fc."""
    B, C, H, W = x.shape
    P, D, heads, depth = cfg["patch"], cfg["dim"], cfg["heads"], cfg["depth"]
    hidden = cfg["mlp_ratio"] * D
    out_dim = cfg["output_dim"]
    nh, nw = H // P, W // P
    npatch = nh * nw
    N = 1 + npatch
    n_pad = ((N + 7) // 8) * 8                      # tokens per image (sublane multiple)
    K = C * P * P
    Kpad = ((K + 127) // 128) * 128                 # lane-aligned contraction dim

    # Group images so the matmul M dim is well filled (up to 128 rows), but keep >= 2
    # groups when B >= 2 so v7x's two TensorCores both get a "parallel" grid step.
    max_g = max(1, 128 // n_pad)
    G = max(1, min(max_g, -(-B // 2))) if B >= 2 else 1
    num_groups = -(-B // G)
    M = G * n_pad
    B_pad = num_groups * G

    f32, bf16 = jnp.float32, jnp.bfloat16

    # --- patch extraction (pure layout; the PxP conv is the in-kernel matmul) ---
    patches = (x.reshape(B, C, nh, P, nw, P)
                 .transpose(0, 2, 4, 1, 3, 5)
                 .reshape(B, npatch, K))
    patches_pad = jnp.zeros((B_pad, n_pad, Kpad), f32)
    patches_pad = patches_pad.at[:B, 1:1 + npatch, :K].set(patches)
    patches_grp = patches_pad.reshape(num_groups, M, Kpad).astype(bf16)

    # --- per-image base rows: [cls+pos0, pos_i+patch_b, 0 pad rows], tiled G times.
    #     Padded token rows of the residual stream are therefore exactly zero. ---
    cls = params["cls_token"].reshape(1, D)
    pos = params["pos_embed"].reshape(N, D)
    pb = params["patch_b"].reshape(1, D)
    base_img = jnp.concatenate(
        [cls + pos[:1], pos[1:] + pb, jnp.zeros((n_pad - N, D), f32)], axis=0)
    base = jnp.tile(base_img, (G, 1))                                  # (M, D)

    # --- block-diagonal additive attention mask (same for every group) ---
    r = jnp.arange(M)
    same_img = (r[:, None] // n_pad) == (r[None, :] // n_pad)
    valid_key = (r[None, :] % n_pad) < N
    mask = jnp.where(same_img & valid_key, 0.0, -1e30).astype(f32)     # (M, M)

    # --- fold LN affine + LayerScale, stack per-block weights (bf16), pack biases ---
    folded = [_fold_block(blk) for blk in params["blocks"]]
    qkvw = jnp.stack([f[0] for f in folded]).astype(bf16)              # (depth, D, 3D)
    projw = jnp.stack([f[1] for f in folded]).astype(bf16)             # (depth, D, D)
    fc1w = jnp.stack([f[2] for f in folded]).astype(bf16)              # (depth, D, 4D)
    fc2w = jnp.stack([f[3] for f in folded]).astype(bf16)              # (depth, 4D, D)
    bias = jnp.zeros((depth, 4, hidden), f32)                          # packed bias slab
    for d, f in enumerate(folded):
        bias = bias.at[d, 0, :3 * D].set(f[4])     # qkv_b (with norm1_b folded)
        bias = bias.at[d, 1, :D].set(f[5])         # proj_b * ls1
        bias = bias.at[d, 2, :hidden].set(f[6])    # fc1_b (with norm2_b folded)
        bias = bias.at[d, 3, :D].set(f[7])         # fc2_b * ls2

    patch_w = jnp.zeros((Kpad, D), f32).at[:K].set(params["patch_w"]).astype(bf16)
    fc_w = (params["norm_g"][:, None] * params["fc_w"]).astype(bf16)
    fc_b = (params["norm_b"] @ params["fc_w"] + params["fc_b"]).reshape(1, out_dim)

    inputs = (patches_grp, base, patch_w, mask,
              qkvw, projw, fc1w, fc2w, bias, fc_w, fc_b)

    def rep(a):  # full-array block, same block every grid step (weights / constants)
        zeros = (0,) * a.ndim
        return pl.BlockSpec(a.shape, lambda g, _z=zeros: _z)

    in_specs = [pl.BlockSpec((pl.Squeezed(), M, Kpad), lambda g: (g, 0, 0))]
    in_specs += [rep(a) for a in inputs[1:]]

    # rough cost estimate so XLA can schedule around the fused call
    hd = D // heads
    blk_flops = (2 * M * D * 3 * D + heads * (4 * M * M * hd)
                 + 2 * M * D * D + 2 * M * D * hidden + 2 * M * hidden * D)
    flops = num_groups * (2 * M * Kpad * D + depth * blk_flops + 2 * M * D * out_dim)
    transcend = num_groups * depth * (heads * M * M + M * hidden)
    bytes_acc = sum(int(a.size) * a.dtype.itemsize for a in inputs) \
        + num_groups * M * out_dim * 4

    out = pl.pallas_call(
        functools.partial(_encoder_kernel, depth=depth, heads=heads, eps=1e-6),
        grid=(num_groups,),
        in_specs=in_specs,
        out_specs=pl.BlockSpec((M, out_dim), lambda g: (g, 0)),
        out_shape=jax.ShapeDtypeStruct((num_groups * M, out_dim), jnp.float32),
        compiler_params=pltpu.CompilerParams(dimension_semantics=("parallel",)),
        cost_estimate=pl.CostEstimate(flops=int(flops),
                                      transcendentals=int(transcend),
                                      bytes_accessed=int(bytes_acc)),
    )(*inputs)
    # pick the cls-token row of each (real) image
    return out.reshape(B_pad, n_pad, out_dim)[:B, 0, :]


# ----------------------------------- main -----------------------------------

if __name__ == "__main__":
    key = jax.random.PRNGKey(0)
    kp, kx = jax.random.split(key)
    params = init_params(kp, CFG)
    x = jax.random.normal(kx, (2, CFG["in_chans"], CFG["img"], CFG["img"]),
                          dtype=jnp.float32)

    fwd = jax.jit(functools.partial(image_encoder_forward, cfg=CFG))
    out = fwd(params, x)
    jax.block_until_ready(out)
    assert out.shape == (2, CFG["output_dim"]), out.shape
    assert bool(jnp.all(jnp.isfinite(out)))
    print("KERNEL_OK")
</pallas_src>

<mosaic_0001>
module attributes {stable_mosaic.version = 11 : i64} {
  func.func @_encoder_kernel(%arg0: i32, %arg1: memref<1x8x640xbf16, #tpu.memory_space<vmem>>, %arg2: memref<8x32xf32, #tpu.memory_space<vmem>>, %arg3: memref<640x32xbf16, #tpu.memory_space<vmem>>, %arg4: memref<8x8xf32, #tpu.memory_space<vmem>>, %arg5: memref<2x32x96xbf16, #tpu.memory_space<vmem>>, %arg6: memref<2x32x32xbf16, #tpu.memory_space<vmem>>, %arg7: memref<2x32x128xbf16, #tpu.memory_space<vmem>>, %arg8: memref<2x128x32xbf16, #tpu.memory_space<vmem>>, %arg9: memref<2x4x128xf32, #tpu.memory_space<vmem>>, %arg10: memref<32x16xbf16, #tpu.memory_space<vmem>>, %arg11: memref<1x16xf32, #tpu.memory_space<vmem>>, %arg12: memref<8x16xf32, #tpu.memory_space<vmem>>) attributes {dimension_semantics = [#tpu.dimension_semantics<parallel>], iteration_bounds = array<i64: 2>, scalar_prefetch = 0 : i64, scratch_operands = 0 : i64, tpu.core_type = #tpu.core_type<tc>, window_params = [{transform_indices = @transform_0, window_bounds = array<i64: 1, 8, 640>}, {pipeline_mode = #tpu.pipeline_mode<synchronous>, transform_indices = @transform_1, window_bounds = array<i64: 8, 32>}, {pipeline_mode = #tpu.pipeline_mode<synchronous>, transform_indices = @transform_2, window_bounds = array<i64: 640, 32>}, {pipeline_mode = #tpu.pipeline_mode<synchronous>, transform_indices = @transform_3, window_bounds = array<i64: 8, 8>}, {pipeline_mode = #tpu.pipeline_mode<synchronous>, transform_indices = @transform_4, window_bounds = array<i64: 2, 32, 96>}, {pipeline_mode = #tpu.pipeline_mode<synchronous>, transform_indices = @transform_5, window_bounds = array<i64: 2, 32, 32>}, {pipeline_mode = #tpu.pipeline_mode<synchronous>, transform_indices = @transform_6, window_bounds = array<i64: 2, 32, 128>}, {pipeline_mode = #tpu.pipeline_mode<synchronous>, transform_indices = @transform_7, window_bounds = array<i64: 2, 128, 32>}, {pipeline_mode = #tpu.pipeline_mode<synchronous>, transform_indices = @transform_8, window_bounds = array<i64: 2, 4, 128>}, {pipeline_mode = #tpu.pipeline_mode<synchronous>, transform_indices = @transform_9, window_bounds = array<i64: 32, 16>}, {pipeline_mode = #tpu.pipeline_mode<synchronous>, transform_indices = @transform_10, window_bounds = array<i64: 1, 16>}, {transform_indices = @transform_11, window_bounds = array<i64: 8, 16>}]} {
    %c0 = arith.constant 0 : index
    %c0_0 = arith.constant 0 : index
    %c0_1 = arith.constant 0 : index
    %0 = vector.load %arg1[%c0, %c0_0, %c0_1] : memref<1x8x640xbf16, #tpu.memory_space<vmem>>, vector<1x8x640xbf16>
    %1 = vector.shape_cast %0 : vector<1x8x640xbf16> to vector<8x640xbf16>
    %c0_2 = arith.constant 0 : index
    %c0_3 = arith.constant 0 : index
    %2 = vector.load %arg3[%c0_2, %c0_3] : memref<640x32xbf16, #tpu.memory_space<vmem>>, vector<640x32xbf16>
    %cst = arith.constant dense<0.000000e+00> : vector<8x32xf32>
    %3 = tpu.matmul %1, %2, %cst {dimension_numbers = #tpu.dot_dimension_numbers<[1], [0], [0], [1], [0, 0, 1, 1], [], []>} : vector<8x640xbf16>, vector<640x32xbf16>, vector<8x32xf32> -> vector<8x32xf32>
    %c0_4 = arith.constant 0 : index
    %c0_5 = arith.constant 0 : index
    %4 = vector.load %arg2[%c0_4, %c0_5] : memref<8x32xf32, #tpu.memory_space<vmem>>, vector<8x32xf32>
    %5 = arith.addf %4, %3 : vector<8x32xf32>
    %c0_6 = arith.constant 0 : index
    %c0_7 = arith.constant 0 : index
    %6 = vector.load %arg4[%c0_6, %c0_7] : memref<8x8xf32, #tpu.memory_space<vmem>>, vector<8x8xf32>
    %c0_8 = arith.constant 0 : index
    %c0_9 = arith.constant 0 : index
    %c0_10 = arith.constant 0 : index
    %7 = vector.load %arg9[%c0_8, %c0_9, %c0_10] : memref<2x4x128xf32, #tpu.memory_space<vmem>>, vector<1x4x128xf32>
    %8 = vector.shape_cast %7 : vector<1x4x128xf32> to vector<4x128xf32>
    %cst_11 = arith.constant dense<0.000000e+00> : vector<8xf32>
    %9 = vector.multi_reduction <add>, %5, %cst_11 [1] : vector<8x32xf32> to vector<8xf32>
    %10 = vector.shape_cast %9 : vector<8xf32> to vector<8x1xf32>
    %cst_12 = arith.constant 3.200000e+01 : f32
    %11 = vector.broadcast %cst_12 : f32 to vector<8x1xf32>
    %12 = arith.divf %10, %11 : vector<8x1xf32>
    %13 = vector.broadcast %12 : vector<8x1xf32> to vector<8x32xf32>
    %14 = arith.subf %5, %13 : vector<8x32xf32>
    %15 = arith.mulf %14, %14 : vector<8x32xf32>
    %cst_13 = arith.constant dense<0.000000e+00> : vector<8xf32>
    %16 = vector.multi_reduction <add>, %15, %cst_13 [1] : vector<8x32xf32> to vector<8xf32>
    %17 = vector.shape_cast %16 : vector<8xf32> to vector<8x1xf32>
    %cst_14 = arith.constant 3.200000e+01 : f32
    %18 = vector.broadcast %cst_14 : f32 to vector<8x1xf32>
    %19 = arith.divf %17, %18 : vector<8x1xf32>
    %20 = vector.broadcast %12 : vector<8x1xf32> to vector<8x32xf32>
    %21 = arith.subf %5, %20 : vector<8x32xf32>
    %cst_15 = arith.constant 9.99999997E-7 : f32
    %22 = vector.broadcast %cst_15 : f32 to vector<8x1xf32>
    %23 = arith.addf %19, %22 : vector<8x1xf32>
    %24 = math.rsqrt %23 : vector<8x1xf32>
    %25 = vector.broadcast %24 : vector<8x1xf32> to vector<8x32xf32>
    %26 = arith.mulf %21, %25 : vector<8x32xf32>
    %27 = arith.truncf %26 : vector<8x32xf32> to vector<8x32xbf16>
    %c0_16 = arith.constant 0 : index
    %c0_17 = arith.constant 0 : index
    %c0_18 = arith.constant 0 : index
    %28 = vector.load %arg5[%c0_16, %c0_17, %c0_18] : memref<2x32x96xbf16, #tpu.memory_space<vmem>>, vector<1x32x96xbf16>
    %29 = vector.shape_cast %28 : vector<1x32x96xbf16> to vector<32x96xbf16>
    %cst_19 = arith.constant dense<0.000000e+00> : vector<8x96xf32>
    %30 = tpu.matmul %27, %29, %cst_19 {dimension_numbers = #tpu.dot_dimension_numbers<[1], [0], [0], [1], [0, 0, 1, 1], [], []>} : vector<8x32xbf16>, vector<32x96xbf16>, vector<8x96xf32> -> vector<8x96xf32>
    %31 = vector.extract_strided_slice %8 {offsets = [0, 0], sizes = [1, 96], strides = [1, 1]} : vector<4x128xf32> to vector<1x96xf32>
    %32 = vector.broadcast %31 : vector<1x96xf32> to vector<8x96xf32>
    %33 = arith.addf %30, %32 : vector<8x96xf32>
    %c0_20 = arith.constant 0 : index
    %c0_21 = arith.constant 0 : index
    %c0_22 = arith.constant 0 : index
    %34 = vector.load %arg6[%c0_20, %c0_21, %c0_22] : memref<2x32x32xbf16, #tpu.memory_space<vmem>>, vector<1x32x32xbf16>
    %35 = vector.shape_cast %34 : vector<1x32x32xbf16> to vector<32x32xbf16>
    %cst_23 = arith.constant 0.000000e+00 : f32
    %36 = vector.broadcast %cst_23 : f32 to vector<8x32xf32>
    %37 = vector.extract_strided_slice %33 {offsets = [0, 0], sizes = [8, 16], strides = [1, 1]} : vector<8x96xf32> to vector<8x16xf32>
    %cst_24 = arith.constant 2.500000e-01 : f32
    %38 = vector.broadcast %cst_24 : f32 to vector<8x16xf32>
    %39 = arith.mulf %37, %38 : vector<8x16xf32>
    %40 = arith.truncf %39 : vector<8x16xf32> to vector<8x16xbf16>
    %41 = vector.extract_strided_slice %33 {offsets = [0, 32], sizes = [8, 16], strides = [1, 1]} : vector<8x96xf32> to vector<8x16xf32>
    %42 = arith.truncf %41 : vector<8x16xf32> to vector<8x16xbf16>
    %43 = vector.extract_strided_slice %33 {offsets = [0, 64], sizes = [8, 16], strides = [1, 1]} : vector<8x96xf32> to vector<8x16xf32>
    %44 = arith.truncf %43 : vector<8x16xf32> to vector<8x16xbf16>
    %cst_25 = arith.constant dense<0.000000e+00> : vector<8x8xf32>
    %45 = tpu.matmul %40, %42, %cst_25 {dimension_numbers = #tpu.dot_dimension_numbers<[1], [1], [0], [0], [0, 0, 1, 0], [], []>} : vector<8x16xbf16>, vector<8x16xbf16>, vector<8x8xf32> -> vector<8x8xf32>
    %46 = arith.addf %45, %6 : vector<8x8xf32>
    %cst_26 = arith.constant dense<0xFF800000> : vector<8xf32>
    %47 = vector.multi_reduction <maximumf>, %46, %cst_26 [1] : vector<8x8xf32> to vector<8xf32>
    %48 = vector.shape_cast %47 : vector<8xf32> to vector<8x1xf32>
    %49 = vector.broadcast %48 : vector<8x1xf32> to vector<8x8xf32>
    %50 = arith.subf %46, %49 : vector<8x8xf32>
    %51 = math.exp %50 : vector<8x8xf32>
    %cst_27 = arith.constant dense<0.000000e+00> : vector<8xf32>
    %52 = vector.multi_reduction <add>, %51, %cst_27 [1] : vector<8x8xf32> to vector<8xf32>
    %53 = vector.shape_cast %52 : vector<8xf32> to vector<8x1xf32>
    %54 = tpu.reciprocal %53 {approx = true} : vector<8x1xf32> -> vector<8x1xf32>
    %55 = vector.broadcast %54 : vector<8x1xf32> to vector<8x8xf32>
    %56 = arith.mulf %51, %55 : vector<8x8xf32>
    %57 = arith.truncf %56 : vector<8x8xf32> to vector<8x8xbf16>
    %cst_28 = arith.constant dense<0.000000e+00> : vector<8x16xf32>
    %58 = tpu.matmul %57, %44, %cst_28 {dimension_numbers = #tpu.dot_dimension_numbers<[1], [0], [0], [1], [0, 0, 1, 1], [], []>} : vector<8x8xbf16>, vector<8x16xbf16>, vector<8x16xf32> -> vector<8x16xf32>
    %59 = arith.truncf %58 : vector<8x16xf32> to vector<8x16xbf16>
    %60 = vector.extract_strided_slice %35 {offsets = [0, 0], sizes = [16, 32], strides = [1, 1]} : vector<32x32xbf16> to vector<16x32xbf16>
    %cst_29 = arith.constant dense<0.000000e+00> : vector<8x32xf32>
    %61 = tpu.matmul %59, %60, %cst_29 {dimension_numbers = #tpu.dot_dimension_numbers<[1], [0], [0], [1], [0, 0, 1, 1], [], []>} : vector<8x16xbf16>, vector<16x32xbf16>, vector<8x32xf32> -> vector<8x32xf32>
    %62 = arith.addf %36, %61 : vector<8x32xf32>
    %63 = vector.extract_strided_slice %33 {offsets = [0, 16], sizes = [8, 16], strides = [1, 1]} : vector<8x96xf32> to vector<8x16xf32>
    %cst_30 = arith.constant 2.500000e-01 : f32
    %64 = vector.broadcast %cst_30 : f32 to vector<8x16xf32>
    %65 = arith.mulf %63, %64 : vector<8x16xf32>
    %66 = arith.truncf %65 : vector<8x16xf32> to vector<8x16xbf16>
    %67 = vector.extract_strided_slice %33 {offsets = [0, 48], sizes = [8, 16], strides = [1, 1]} : vector<8x96xf32> to vector<8x16xf32>
    %68 = arith.truncf %67 : vector<8x16xf32> to vector<8x16xbf16>
    %69 = vector.extract_strided_slice %33 {offsets = [0, 80], sizes = [8, 16], strides = [1, 1]} : vector<8x96xf32> to vector<8x16xf32>
    %70 = arith.truncf %69 : vector<8x16xf32> to vector<8x16xbf16>
    %cst_31 = arith.constant dense<0.000000e+00> : vector<8x8xf32>
    %71 = tpu.matmul %66, %68, %cst_31 {dimension_numbers = #tpu.dot_dimension_numbers<[1], [1], [0], [0], [0, 0, 1, 0], [], []>} : vector<8x16xbf16>, vector<8x16xbf16>, vector<8x8xf32> -> vector<8x8xf32>
    %72 = arith.addf %71, %6 : vector<8x8xf32>
    %cst_32 = arith.constant dense<0xFF800000> : vector<8xf32>
    %73 = vector.multi_reduction <maximumf>, %72, %cst_32 [1] : vector<8x8xf32> to vector<8xf32>
    %74 = vector.shape_cast %73 : vector<8xf32> to vector<8x1xf32>
    %75 = vector.broadcast %74 : vector<8x1xf32> to vector<8x8xf32>
    %76 = arith.subf %72, %75 : vector<8x8xf32>
    %77 = math.exp %76 : vector<8x8xf32>
    %cst_33 = arith.constant dense<0.000000e+00> : vector<8xf32>
    %78 = vector.multi_reduction <add>, %77, %cst_33 [1] : vector<8x8xf32> to vector<8xf32>
    %79 = vector.shape_cast %78 : vector<8xf32> to vector<8x1xf32>
    %80 = tpu.reciprocal %79 {approx = true} : vector<8x1xf32> -> vector<8x1xf32>
    %81 = vector.broadcast %80 : vector<8x1xf32> to vector<8x8xf32>
    %82 = arith.mulf %77, %81 : vector<8x8xf32>
    %83 = arith.truncf %82 : vector<8x8xf32> to vector<8x8xbf16>
    %cst_34 = arith.constant dense<0.000000e+00> : vector<8x16xf32>
    %84 = tpu.matmul %83, %70, %cst_34 {dimension_numbers = #tpu.dot_dimension_numbers<[1], [0], [0], [1], [0, 0, 1, 1], [], []>} : vector<8x8xbf16>, vector<8x16xbf16>, vector<8x16xf32> -> vector<8x16xf32>
    %85 = arith.truncf %84 : vector<8x16xf32> to vector<8x16xbf16>
    %86 = vector.extract_strided_slice %35 {offsets = [16, 0], sizes = [16, 32], strides = [1, 1]} : vector<32x32xbf16> to vector<16x32xbf16>
    %cst_35 = arith.constant dense<0.000000e+00> : vector<8x32xf32>
    %87 = tpu.matmul %85, %86, %cst_35 {dimension_numbers = #tpu.dot_dimension_numbers<[1], [0], [0], [1], [0, 0, 1, 1], [], []>} : vector<8x16xbf16>, vector<16x32xbf16>, vector<8x32xf32> -> vector<8x32xf32>
    %88 = arith.addf %62, %87 : vector<8x32xf32>
    %89 = arith.addf %5, %88 : vector<8x32xf32>
    %90 = vector.extract_strided_slice %8 {offsets = [1, 0], sizes = [1, 32], strides = [1, 1]} : vector<4x128xf32> to vector<1x32xf32>
    %91 = vector.broadcast %90 : vector<1x32xf32> to vector<8x32xf32>
    %92 = arith.addf %89, %91 : vector<8x32xf32>
    %cst_36 = arith.constant dense<0.000000e+00> : vector<8xf32>
    %93 = vector.multi_reduction <add>, %92, %cst_36 [1] : vector<8x32xf32> to vector<8xf32>
    %94 = vector.shape_cast %93 : vector<8xf32> to vector<8x1xf32>
    %cst_37 = arith.constant 3.200000e+01 : f32
    %95 = vector.broadcast %cst_37 : f32 to vector<8x1xf32>
    %96 = arith.divf %94, %95 : vector<8x1xf32>
    %97 = vector.broadcast %96 : vector<8x1xf32> to vector<8x32xf32>
    %98 = arith.subf %92, %97 : vector<8x32xf32>
    %99 = arith.mulf %98, %98 : vector<8x32xf32>
    %cst_38 = arith.constant dense<0.000000e+00> : vector<8xf32>
    %100 = vector.multi_reduction <add>, %99, %cst_38 [1] : vector<8x32xf32> to vector<8xf32>
    %101 = vector.shape_cast %100 : vector<8xf32> to vector<8x1xf32>
    %cst_39 = arith.constant 3.200000e+01 : f32
    %102 = vector.broadcast %cst_39 : f32 to vector<8x1xf32>
    %103 = arith.divf %101, %102 : vector<8x1xf32>
    %104 = vector.broadcast %96 : vector<8x1xf32> to vector<8x32xf32>
    %105 = arith.subf %92, %104 : vector<8x32xf32>
    %cst_40 = arith.constant 9.99999997E-7 : f32
    %106 = vector.broadcast %cst_40 : f32 to vector<8x1xf32>
    %107 = arith.addf %103, %106 : vector<8x1xf32>
    %108 = math.rsqrt %107 : vector<8x1xf32>
    %109 = vector.broadcast %108 : vector<8x1xf32> to vector<8x32xf32>
    %110 = arith.mulf %105, %109 : vector<8x32xf32>
    %111 = arith.truncf %110 : vector<8x32xf32> to vector<8x32xbf16>
    %c0_41 = arith.constant 0 : index
    %c0_42 = arith.constant 0 : index
    %c0_43 = arith.constant 0 : index
    %112 = vector.load %arg7[%c0_41, %c0_42, %c0_43] : memref<2x32x128xbf16, #tpu.memory_space<vmem>>, vector<1x32x128xbf16>
    %113 = vector.shape_cast %112 : vector<1x32x128xbf16> to vector<32x128xbf16>
    %cst_44 = arith.constant dense<0.000000e+00> : vector<8x128xf32>
    %114 = tpu.matmul %111, %113, %cst_44 {dimension_numbers = #tpu.dot_dimension_numbers<[1], [0], [0], [1], [0, 0, 1, 1], [], []>} : vector<8x32xbf16>, vector<32x128xbf16>, vector<8x128xf32> -> vector<8x128xf32>
    %115 = vector.extract_strided_slice %8 {offsets = [2, 0], sizes = [1, 128], strides = [1, 1]} : vector<4x128xf32> to vector<1x128xf32>
    %116 = vector.broadcast %115 : vector<1x128xf32> to vector<8x128xf32>
    %117 = arith.addf %114, %116 : vector<8x128xf32>
    %cst_45 = arith.constant 5.000000e-01 : f32
    %118 = vector.broadcast %cst_45 : f32 to vector<8x128xf32>
    %119 = arith.mulf %118, %117 : vector<8x128xf32>
    %cst_46 = arith.constant 0.707106769 : f32
    %120 = vector.broadcast %cst_46 : f32 to vector<8x128xf32>
    %121 = arith.mulf %117, %120 : vector<8x128xf32>
    %122 = math.erf %121 : vector<8x128xf32>
    %cst_47 = arith.constant 1.000000e+00 : f32
    %123 = vector.broadcast %cst_47 : f32 to vector<8x128xf32>
    %124 = arith.addf %123, %122 : vector<8x128xf32>
    %125 = arith.mulf %119, %124 : vector<8x128xf32>
    %126 = arith.truncf %125 : vector<8x128xf32> to vector<8x128xbf16>
    %c0_48 = arith.constant 0 : index
    %c0_49 = arith.constant 0 : index
    %c0_50 = arith.constant 0 : index
    %127 = vector.load %arg8[%c0_48, %c0_49, %c0_50] : memref<2x128x32xbf16, #tpu.memory_space<vmem>>, vector<1x128x32xbf16>
    %128 = vector.shape_cast %127 : vector<1x128x32xbf16> to vector<128x32xbf16>
    %cst_51 = arith.constant dense<0.000000e+00> : vector<8x32xf32>
    %129 = tpu.matmul %126, %128, %cst_51 {dimension_numbers = #tpu.dot_dimension_numbers<[1], [0], [0], [1], [0, 0, 1, 1], [], []>} : vector<8x128xbf16>, vector<128x32xbf16>, vector<8x32xf32> -> vector<8x32xf32>
    %130 = vector.extract_strided_slice %8 {offsets = [3, 0], sizes = [1, 32], strides = [1, 1]} : vector<4x128xf32> to vector<1x32xf32>
    %131 = vector.broadcast %130 : vector<1x32xf32> to vector<8x32xf32>
    %132 = arith.addf %129, %131 : vector<8x32xf32>
    %133 = arith.addf %92, %132 : vector<8x32xf32>
    %c1 = arith.constant 1 : index
    %c0_52 = arith.constant 0 : index
    %c0_53 = arith.constant 0 : index
    %134 = vector.load %arg9[%c1, %c0_52, %c0_53] : memref<2x4x128xf32, #tpu.memory_space<vmem>>, vector<1x4x128xf32>
    %135 = vector.shape_cast %134 : vector<1x4x128xf32> to vector<4x128xf32>
    %cst_54 = arith.constant dense<0.000000e+00> : vector<8xf32>
    %136 = vector.multi_reduction <add>, %133, %cst_54 [1] : vector<8x32xf32> to vector<8xf32>
    %137 = vector.shape_cast %136 : vector<8xf32> to vector<8x1xf32>
    %cst_55 = arith.constant 3.200000e+01 : f32
    %138 = vector.broadcast %cst_55 : f32 to vector<8x1xf32>
    %139 = arith.divf %137, %138 : vector<8x1xf32>
    %140 = vector.broadcast %139 : vector<8x1xf32> to vector<8x32xf32>
    %141 = arith.subf %133, %140 : vector<8x32xf32>
    %142 = arith.mulf %141, %141 : vector<8x32xf32>
    %cst_56 = arith.constant dense<0.000000e+00> : vector<8xf32>
    %143 = vector.multi_reduction <add>, %142, %cst_56 [1] : vector<8x32xf32> to vector<8xf32>
    %144 = vector.shape_cast %143 : vector<8xf32> to vector<8x1xf32>
    %cst_57 = arith.constant 3.200000e+01 : f32
    %145 = vector.broadcast %cst_57 : f32 to vector<8x1xf32>
    %146 = arith.divf %144, %145 : vector<8x1xf32>
    %147 = vector.broadcast %139 : vector<8x1xf32> to vector<8x32xf32>
    %148 = arith.subf %133, %147 : vector<8x32xf32>
    %cst_58 = arith.constant 9.99999997E-7 : f32
    %149 = vector.broadcast %cst_58 : f32 to vector<8x1xf32>
    %150 = arith.addf %146, %149 : vector<8x1xf32>
    %151 = math.rsqrt %150 : vector<8x1xf32>
    %152 = vector.broadcast %151 : vector<8x1xf32> to vector<8x32xf32>
    %153 = arith.mulf %148, %152 : vector<8x32xf32>
    %154 = arith.truncf %153 : vector<8x32xf32> to vector<8x32xbf16>
    %c1_59 = arith.constant 1 : index
    %c0_60 = arith.constant 0 : index
    %c0_61 = arith.constant 0 : index
    %155 = vector.load %arg5[%c1_59, %c0_60, %c0_61] : memref<2x32x96xbf16, #tpu.memory_space<vmem>>, vector<1x32x96xbf16>
    %156 = vector.shape_cast %155 : vector<1x32x96xbf16> to vector<32x96xbf16>
    %cst_62 = arith.constant dense<0.000000e+00> : vector<8x96xf32>
    %157 = tpu.matmul %154, %156, %cst_62 {dimension_numbers = #tpu.dot_dimension_numbers<[1], [0], [0], [1], [0, 0, 1, 1], [], []>} : vector<8x32xbf16>, vector<32x96xbf16>, vector<8x96xf32> -> vector<8x96xf32>
    %158 = vector.extract_strided_slice %135 {offsets = [0, 0], sizes = [1, 96], strides = [1, 1]} : vector<4x128xf32> to vector<1x96xf32>
    %159 = vector.broadcast %158 : vector<1x96xf32> to vector<8x96xf32>
    %160 = arith.addf %157, %159 : vector<8x96xf32>
    %c1_63 = arith.constant 1 : index
    %c0_64 = arith.constant 0 : index
    %c0_65 = arith.constant 0 : index
    %161 = vector.load %arg6[%c1_63, %c0_64, %c0_65] : memref<2x32x32xbf16, #tpu.memory_space<vmem>>, vector<1x32x32xbf16>
    %162 = vector.shape_cast %161 : vector<1x32x32xbf16> to vector<32x32xbf16>
    %cst_66 = arith.constant 0.000000e+00 : f32
    %163 = vector.broadcast %cst_66 : f32 to vector<8x32xf32>
    %164 = vector.extract_strided_slice %160 {offsets = [0, 0], sizes = [8, 16], strides = [1, 1]} : vector<8x96xf32> to vector<8x16xf32>
    %cst_67 = arith.constant 2.500000e-01 : f32
    %165 = vector.broadcast %cst_67 : f32 to vector<8x16xf32>
    %166 = arith.mulf %164, %165 : vector<8x16xf32>
    %167 = arith.truncf %166 : vector<8x16xf32> to vector<8x16xbf16>
    %168 = vector.extract_strided_slice %160 {offsets = [0, 32], sizes = [8, 16], strides = [1, 1]} : vector<8x96xf32> to vector<8x16xf32>
    %169 = arith.truncf %168 : vector<8x16xf32> to vector<8x16xbf16>
    %170 = vector.extract_strided_slice %160 {offsets = [0, 64], sizes = [8, 16], strides = [1, 1]} : vector<8x96xf32> to vector<8x16xf32>
    %171 = arith.truncf %170 : vector<8x16xf32> to vector<8x16xbf16>
    %cst_68 = arith.constant dense<0.000000e+00> : vector<8x8xf32>
    %172 = tpu.matmul %167, %169, %cst_68 {dimension_numbers = #tpu.dot_dimension_numbers<[1], [1], [0], [0], [0, 0, 1, 0], [], []>} : vector<8x16xbf16>, vector<8x16xbf16>, vector<8x8xf32> -> vector<8x8xf32>
    %173 = arith.addf %172, %6 : vector<8x8xf32>
    %cst_69 = arith.constant dense<0xFF800000> : vector<8xf32>
    %174 = vector.multi_reduction <maximumf>, %173, %cst_69 [1] : vector<8x8xf32> to vector<8xf32>
    %175 = vector.shape_cast %174 : vector<8xf32> to vector<8x1xf32>
    %176 = vector.broadcast %175 : vector<8x1xf32> to vector<8x8xf32>
    %177 = arith.subf %173, %176 : vector<8x8xf32>
    %178 = math.exp %177 : vector<8x8xf32>
    %cst_70 = arith.constant dense<0.000000e+00> : vector<8xf32>
    %179 = vector.multi_reduction <add>, %178, %cst_70 [1] : vector<8x8xf32> to vector<8xf32>
    %180 = vector.shape_cast %179 : vector<8xf32> to vector<8x1xf32>
    %181 = tpu.reciprocal %180 {approx = true} : vector<8x1xf32> -> vector<8x1xf32>
    %182 = vector.broadcast %181 : vector<8x1xf32> to vector<8x8xf32>
    %183 = arith.mulf %178, %182 : vector<8x8xf32>
    %184 = arith.truncf %183 : vector<8x8xf32> to vector<8x8xbf16>
    %cst_71 = arith.constant dense<0.000000e+00> : vector<8x16xf32>
    %185 = tpu.matmul %184, %171, %cst_71 {dimension_numbers = #tpu.dot_dimension_numbers<[1], [0], [0], [1], [0, 0, 1, 1], [], []>} : vector<8x8xbf16>, vector<8x16xbf16>, vector<8x16xf32> -> vector<8x16xf32>
    %186 = arith.truncf %185 : vector<8x16xf32> to vector<8x16xbf16>
    %187 = vector.extract_strided_slice %162 {offsets = [0, 0], sizes = [16, 32], strides = [1, 1]} : vector<32x32xbf16> to vector<16x32xbf16>
    %cst_72 = arith.constant dense<0.000000e+00> : vector<8x32xf32>
    %188 = tpu.matmul %186, %187, %cst_72 {dimension_numbers = #tpu.dot_dimension_numbers<[1], [0], [0], [1], [0, 0, 1, 1], [], []>} : vector<8x16xbf16>, vector<16x32xbf16>, vector<8x32xf32> -> vector<8x32xf32>
    %189 = arith.addf %163, %188 : vector<8x32xf32>
    %190 = vector.extract_strided_slice %160 {offsets = [0, 16], sizes = [8, 16], strides = [1, 1]} : vector<8x96xf32> to vector<8x16xf32>
    %cst_73 = arith.constant 2.500000e-01 : f32
    %191 = vector.broadcast %cst_73 : f32 to vector<8x16xf32>
    %192 = arith.mulf %190, %191 : vector<8x16xf32>
    %193 = arith.truncf %192 : vector<8x16xf32> to vector<8x16xbf16>
    %194 = vector.extract_strided_slice %160 {offsets = [0, 48], sizes = [8, 16], strides = [1, 1]} : vector<8x96xf32> to vector<8x16xf32>
    %195 = arith.truncf %194 : vector<8x16xf32> to vector<8x16xbf16>
    %196 = vector.extract_strided_slice %160 {offsets = [0, 80], sizes = [8, 16], strides = [1, 1]} : vector<8x96xf32> to vector<8x16xf32>
    %197 = arith.truncf %196 : vector<8x16xf32> to vector<8x16xbf16>
    %cst_74 = arith.constant dense<0.000000e+00> : vector<8x8xf32>
    %198 = tpu.matmul %193, %195, %cst_74 {dimension_numbers = #tpu.dot_dimension_numbers<[1], [1], [0], [0], [0, 0, 1, 0], [], []>} : vector<8x16xbf16>, vector<8x16xbf16>, vector<8x8xf32> -> vector<8x8xf32>
    %199 = arith.addf %198, %6 : vector<8x8xf32>
    %cst_75 = arith.constant dense<0xFF800000> : vector<8xf32>
    %200 = vector.multi_reduction <maximumf>, %199, %cst_75 [1] : vector<8x8xf32> to vector<8xf32>
    %201 = vector.shape_cast %200 : vector<8xf32> to vector<8x1xf32>
    %202 = vector.broadcast %201 : vector<8x1xf32> to vector<8x8xf32>
    %203 = arith.subf %199, %202 : vector<8x8xf32>
    %204 = math.exp %203 : vector<8x8xf32>
    %cst_76 = arith.constant dense<0.000000e+00> : vector<8xf32>
    %205 = vector.multi_reduction <add>, %204, %cst_76 [1] : vector<8x8xf32> to vector<8xf32>
    %206 = vector.shape_cast %205 : vector<8xf32> to vector<8x1xf32>
    %207 = tpu.reciprocal %206 {approx = true} : vector<8x1xf32> -> vector<8x1xf32>
    %208 = vector.broadcast %207 : vector<8x1xf32> to vector<8x8xf32>
    %209 = arith.mulf %204, %208 : vector<8x8xf32>
    %210 = arith.truncf %209 : vector<8x8xf32> to vector<8x8xbf16>
    %cst_77 = arith.constant dense<0.000000e+00> : vector<8x16xf32>
    %211 = tpu.matmul %210, %197, %cst_77 {dimension_numbers = #tpu.dot_dimension_numbers<[1], [0], [0], [1], [0, 0, 1, 1], [], []>} : vector<8x8xbf16>, vector<8x16xbf16>, vector<8x16xf32> -> vector<8x16xf32>
    %212 = arith.truncf %211 : vector<8x16xf32> to vector<8x16xbf16>
    %213 = vector.extract_strided_slice %162 {offsets = [16, 0], sizes = [16, 32], strides = [1, 1]} : vector<32x32xbf16> to vector<16x32xbf16>
    %cst_78 = arith.constant dense<0.000000e+00> : vector<8x32xf32>
    %214 = tpu.matmul %212, %213, %cst_78 {dimension_numbers = #tpu.dot_dimension_numbers<[1], [0], [0], [1], [0, 0, 1, 1], [], []>} : vector<8x16xbf16>, vector<16x32xbf16>, vector<8x32xf32> -> vector<8x32xf32>
    %215 = arith.addf %189, %214 : vector<8x32xf32>
    %216 = arith.addf %133, %215 : vector<8x32xf32>
    %217 = vector.extract_strided_slice %135 {offsets = [1, 0], sizes = [1, 32], strides = [1, 1]} : vector<4x128xf32> to vector<1x32xf32>
    %218 = vector.broadcast %217 : vector<1x32xf32> to vector<8x32xf32>
    %219 = arith.addf %216, %218 : vector<8x32xf32>
    %cst_79 = arith.constant dense<0.000000e+00> : vector<8xf32>
    %220 = vector.multi_reduction <add>, %219, %cst_79 [1] : vector<8x32xf32> to vector<8xf32>
    %221 = vector.shape_cast %220 : vector<8xf32> to vector<8x1xf32>
    %cst_80 = arith.constant 3.200000e+01 : f32
    %222 = vector.broadcast %cst_80 : f32 to vector<8x1xf32>
    %223 = arith.divf %221, %222 : vector<8x1xf32>
    %224 = vector.broadcast %223 : vector<8x1xf32> to vector<8x32xf32>
    %225 = arith.subf %219, %224 : vector<8x32xf32>
    %226 = arith.mulf %225, %225 : vector<8x32xf32>
    %cst_81 = arith.constant dense<0.000000e+00> : vector<8xf32>
    %227 = vector.multi_reduction <add>, %226, %cst_81 [1] : vector<8x32xf32> to vector<8xf32>
    %228 = vector.shape_cast %227 : vector<8xf32> to vector<8x1xf32>
    %cst_82 = arith.constant 3.200000e+01 : f32
    %229 = vector.broadcast %cst_82 : f32 to vector<8x1xf32>
    %230 = arith.divf %228, %229 : vector<8x1xf32>
    %231 = vector.broadcast %223 : vector<8x1xf32> to vector<8x32xf32>
    %232 = arith.subf %219, %231 : vector<8x32xf32>
    %cst_83 = arith.constant 9.99999997E-7 : f32
    %233 = vector.broadcast %cst_83 : f32 to vector<8x1xf32>
    %234 = arith.addf %230, %233 : vector<8x1xf32>
    %235 = math.rsqrt %234 : vector<8x1xf32>
    %236 = vector.broadcast %235 : vector<8x1xf32> to vector<8x32xf32>
    %237 = arith.mulf %232, %236 : vector<8x32xf32>
    %238 = arith.truncf %237 : vector<8x32xf32> to vector<8x32xbf16>
    %c1_84 = arith.constant 1 : index
    %c0_85 = arith.constant 0 : index
    %c0_86 = arith.constant 0 : index
    %239 = vector.load %arg7[%c1_84, %c0_85, %c0_86] : memref<2x32x128xbf16, #tpu.memory_space<vmem>>, vector<1x32x128xbf16>
    %240 = vector.shape_cast %239 : vector<1x32x128xbf16> to vector<32x128xbf16>
    %cst_87 = arith.constant dense<0.000000e+00> : vector<8x128xf32>
    %241 = tpu.matmul %238, %240, %cst_87 {dimension_numbers = #tpu.dot_dimension_numbers<[1], [0], [0], [1], [0, 0, 1, 1], [], []>} : vector<8x32xbf16>, vector<32x128xbf16>, vector<8x128xf32> -> vector<8x128xf32>
    %242 = vector.extract_strided_slice %135 {offsets = [2, 0], sizes = [1, 128], strides = [1, 1]} : vector<4x128xf32> to vector<1x128xf32>
    %243 = vector.broadcast %242 : vector<1x128xf32> to vector<8x128xf32>
    %244 = arith.addf %241, %243 : vector<8x128xf32>
    %cst_88 = arith.constant 5.000000e-01 : f32
    %245 = vector.broadcast %cst_88 : f32 to vector<8x128xf32>
    %246 = arith.mulf %245, %244 : vector<8x128xf32>
    %cst_89 = arith.constant 0.707106769 : f32
    %247 = vector.broadcast %cst_89 : f32 to vector<8x128xf32>
    %248 = arith.mulf %244, %247 : vector<8x128xf32>
    %249 = math.erf %248 : vector<8x128xf32>
    %cst_90 = arith.constant 1.000000e+00 : f32
    %250 = vector.broadcast %cst_90 : f32 to vector<8x128xf32>
    %251 = arith.addf %250, %249 : vector<8x128xf32>
    %252 = arith.mulf %246, %251 : vector<8x128xf32>
    %253 = arith.truncf %252 : vector<8x128xf32> to vector<8x128xbf16>
    %c1_91 = arith.constant 1 : index
    %c0_92 = arith.constant 0 : index
    %c0_93 = arith.constant 0 : index
    %254 = vector.load %arg8[%c1_91, %c0_92, %c0_93] : memref<2x128x32xbf16, #tpu.memory_space<vmem>>, vector<1x128x32xbf16>
    %255 = vector.shape_cast %254 : vector<1x128x32xbf16> to vector<128x32xbf16>
    %cst_94 = arith.constant dense<0.000000e+00> : vector<8x32xf32>
    %256 = tpu.matmul %253, %255, %cst_94 {dimension_numbers = #tpu.dot_dimension_numbers<[1], [0], [0], [1], [0, 0, 1, 1], [], []>} : vector<8x128xbf16>, vector<128x32xbf16>, vector<8x32xf32> -> vector<8x32xf32>
    %257 = vector.extract_strided_slice %135 {offsets = [3, 0], sizes = [1, 32], strides = [1, 1]} : vector<4x128xf32> to vector<1x32xf32>
    %258 = vector.broadcast %257 : vector<1x32xf32> to vector<8x32xf32>
    %259 = arith.addf %256, %258 : vector<8x32xf32>
    %260 = arith.addf %219, %259 : vector<8x32xf32>
    %cst_95 = arith.constant dense<0.000000e+00> : vector<8xf32>
    %261 = vector.multi_reduction <add>, %260, %cst_95 [1] : vector<8x32xf32> to vector<8xf32>
    %262 = vector.shape_cast %261 : vector<8xf32> to vector<8x1xf32>
    %cst_96 = arith.constant 3.200000e+01 : f32
    %263 = vector.broadcast %cst_96 : f32 to vector<8x1xf32>
    %264 = arith.divf %262, %263 : vector<8x1xf32>
    %265 = vector.broadcast %264 : vector<8x1xf32> to vector<8x32xf32>
    %266 = arith.subf %260, %265 : vector<8x32xf32>
    %267 = arith.mulf %266, %266 : vector<8x32xf32>
    %cst_97 = arith.constant dense<0.000000e+00> : vector<8xf32>
    %268 = vector.multi_reduction <add>, %267, %cst_97 [1] : vector<8x32xf32> to vector<8xf32>
    %269 = vector.shape_cast %268 : vector<8xf32> to vector<8x1xf32>
    %cst_98 = arith.constant 3.200000e+01 : f32
    %270 = vector.broadcast %cst_98 : f32 to vector<8x1xf32>
    %271 = arith.divf %269, %270 : vector<8x1xf32>
    %272 = vector.broadcast %264 : vector<8x1xf32> to vector<8x32xf32>
    %273 = arith.subf %260, %272 : vector<8x32xf32>
    %cst_99 = arith.constant 9.99999997E-7 : f32
    %274 = vector.broadcast %cst_99 : f32 to vector<8x1xf32>
    %275 = arith.addf %271, %274 : vector<8x1xf32>
    %276 = math.rsqrt %275 : vector<8x1xf32>
    %277 = vector.broadcast %276 : vector<8x1xf32> to vector<8x32xf32>
    %278 = arith.mulf %273, %277 : vector<8x32xf32>
    %279 = arith.truncf %278 : vector<8x32xf32> to vector<8x32xbf16>
    %c0_100 = arith.constant 0 : index
    %c0_101 = arith.constant 0 : index
    %280 = vector.load %arg10[%c0_100, %c0_101] : memref<32x16xbf16, #tpu.memory_space<vmem>>, vector<32x16xbf16>
    %cst_102 = arith.constant dense<0.000000e+00> : vector<8x16xf32>
    %281 = tpu.matmul %279, %280, %cst_102 {dimension_numbers = #tpu.dot_dimension_numbers<[1], [0], [0], [1], [0, 0, 1, 1], [], []>} : vector<8x32xbf16>, vector<32x16xbf16>, vector<8x16xf32> -> vector<8x16xf32>
    %c0_103 = arith.constant 0 : index
    %c0_104 = arith.constant 0 : index
    %282 = vector.load %arg11[%c0_103, %c0_104] : memref<1x16xf32, #tpu.memory_space<vmem>>, vector<1x16xf32>
    %283 = vector.broadcast %282 : vector<1x16xf32> to vector<8x16xf32>
    %284 = arith.addf %281, %283 : vector<8x16xf32>
    %c0_105 = arith.constant 0 : index
    %c0_106 = arith.constant 0 : index
    %285 = vector.load %arg12[%c0_105, %c0_106] : memref<8x16xf32, #tpu.memory_space<vmem>>, vector<8x16xf32>
    tpu.vector_store %arg12[%c0_105, %c0_106], %284 {strides = array<i32>} : memref<8x16xf32, #tpu.memory_space<vmem>>, vector<8x16xf32>,
    return
  }
  func.func @transform_0(%arg0: i32) -> (i32, i32, i32) {
    %c0_i32 = arith.constant 0 : i32
    %c0_i32_0 = arith.constant 0 : i32
    %c0_i32_1 = arith.constant 0 : i32
    return %arg0, %c0_i32, %c0_i32_0 : i32, i32, i32
  }
  func.func @transform_1(%arg0: i32) -> (i32, i32) {
    %c0_i32 = arith.constant 0 : i32
    %c0_i32_0 = arith.constant 0 : i32
    %c0_i32_1 = arith.constant 0 : i32
    return %c0_i32, %c0_i32_0 : i32, i32
  }
  func.func @transform_2(%arg0: i32) -> (i32, i32) {
    %c0_i32 = arith.constant 0 : i32
    %c0_i32_0 = arith.constant 0 : i32
    %c0_i32_1 = arith.constant 0 : i32
    return %c0_i32, %c0_i32_0 : i32, i32
  }
  func.func @transform_3(%arg0: i32) -> (i32, i32) {
    %c0_i32 = arith.constant 0 : i32
    %c0_i32_0 = arith.constant 0 : i32
    %c0_i32_1 = arith.constant 0 : i32
    return %c0_i32, %c0_i32_0 : i32, i32
  }
  func.func @transform_4(%arg0: i32) -> (i32, i32, i32) {
    %c0_i32 = arith.constant 0 : i32
    %c0_i32_0 = arith.constant 0 : i32
    %c0_i32_1 = arith.constant 0 : i32
    %c0_i32_2 = arith.constant 0 : i32
    return %c0_i32, %c0_i32_0, %c0_i32_1 : i32, i32, i32
  }
  func.func @transform_5(%arg0: i32) -> (i32, i32, i32) {
    %c0_i32 = arith.constant 0 : i32
    %c0_i32_0 = arith.constant 0 : i32
    %c0_i32_1 = arith.constant 0 : i32
    %c0_i32_2 = arith.constant 0 : i32
    return %c0_i32, %c0_i32_0, %c0_i32_1 : i32, i32, i32
  }
  func.func @transform_6(%arg0: i32) -> (i32, i32, i32) {
    %c0_i32 = arith.constant 0 : i32
    %c0_i32_0 = arith.constant 0 : i32
    %c0_i32_1 = arith.constant 0 : i32
    %c0_i32_2 = arith.constant 0 : i32
    return %c0_i32, %c0_i32_0, %c0_i32_1 : i32, i32, i32
  }
  func.func @transform_7(%arg0: i32) -> (i32, i32, i32) {
    %c0_i32 = arith.constant 0 : i32
    %c0_i32_0 = arith.constant 0 : i32
    %c0_i32_1 = arith.constant 0 : i32
    %c0_i32_2 = arith.constant 0 : i32
    return %c0_i32, %c0_i32_0, %c0_i32_1 : i32, i32, i32
  }
  func.func @transform_8(%arg0: i32) -> (i32, i32, i32) {
    %c0_i32 = arith.constant 0 : i32
    %c0_i32_0 = arith.constant 0 : i32
    %c0_i32_1 = arith.constant 0 : i32
    %c0_i32_2 = arith.constant 0 : i32
    return %c0_i32, %c0_i32_0, %c0_i32_1 : i32, i32, i32
  }
  func.func @transform_9(%arg0: i32) -> (i32, i32) {
    %c0_i32 = arith.constant 0 : i32
    %c0_i32_0 = arith.constant 0 : i32
    %c0_i32_1 = arith.constant 0 : i32
    return %c0_i32, %c0_i32_0 : i32, i32
  }
  func.func @transform_10(%arg0: i32) -> (i32, i32) {
    %c0_i32 = arith.constant 0 : i32
    %c0_i32_0 = arith.constant 0 : i32
    %c0_i32_1 = arith.constant 0 : i32
    return %c0_i32, %c0_i32_0 : i32, i32
  }
  func.func @transform_11(%arg0: i32) -> (i32, i32) {
    %c0_i32 = arith.constant 0 : i32
    %c0_i32_0 = arith.constant 0 : i32
    return %arg0, %c0_i32 : i32, i32
  }
}

</mosaic_0001>

<bundles_post_ra>
// kernel: image_encoder_forward.1
= control target key start
LH: loop header
LB: loop body
LE: loop exit
PB: predicated region body
PF: predicated region fallthrough
CT: control target
= control target key end

     0   :  { %s2263_s17 = smov 0   ;;  %s2622_s0 = inlined_call_operand.vmem [shape: bf16[2,8,640], index: 0, kind: input, shape index: {}]   ;;  %s2623_s1 = inlined_call_operand.vmem [shape: f32[8,32], index: 1, kind: input, shape index: {}]   ;;  %s2624_s2 = inlined_call_operand.vmem [shape: bf16[640,32], index: 2, kind: input, shape index: {}]   ;;  %s2625_s3 = inlined_call_operand.vmem [shape: f32[8,8], index: 3, kind: input, shape index: {}]   ;;  %s2626_s4 = inlined_call_operand.vmem [shape: bf16[2,32,96], index: 4, kind: input, shape index: {}]   ;;  %s2627_s5 = inlined_call_operand.vmem [shape: bf16[2,32,32], index: 5, kind: input, shape index: {}]   ;;  %s2628_s6 = inlined_call_operand.vmem [shape: bf16[2,32,128], index: 6, kind: input, shape index: {}]   ;;  %s2629_s7 = inlined_call_operand.vmem [shape: bf16[2,128,32], index: 7, kind: input, shape index: {}]   ;;  %s2630_s8 = inlined_call_operand.vmem [shape: f32[2,4,128], index: 8, kind: input, shape index: {}]   ;;  %s2631_s9 = inlined_call_operand.vmem [shape: bf16[32,16], index: 9, kind: input, shape index: {}]   ;;  %s2632_s10 = inlined_call_operand.vmem [shape: f32[1,16], index: 10, kind: input, shape index: {}]   ;;  %s2633_s11 = inlined_call_operand.vmem [shape: f32[16,16], index: 11, kind: output, shape index: {}]  }
   0x1 LB: > { %s1734_s18 = sadd.s32 4294967295, %s2195_s17   ;;  %p1738_p0 = scmp.ge.s32.totalorder %s2195_s17, 1  ;;  %s2195_s17 = sphi %s2263_s17, %s21_s17  }
   0x2   : > { %p337_p1 = scmp.lt.s32.totalorder %s2195_s17, 3 }
   0x4   : > { %p338_p2 = pnand %p1738_p0, %p337_p1 }
   0x5   : > { %p376_p3 = scmp.lt.s32.totalorder (!%p338_p2), %s1734_s18, 1  ;;  %s2198_s27 = smov (!%p338_p2), 96  }
   0x6   : > { %341 = sbr.rel (%p338_p2) target bundleno = 4150 (0x1036), region = 64  ;;  %s2199_s28 = smov (!%p338_p2), 112  }
   0x7   : > { %s2200_s29 = smov (!%p338_p2), 80   ;;  %s2201_s13 = smov (!%p338_p2), 48  }
   0x8   : > { %s2202_s14 = smov (!%p338_p2), 64  }
   0xb   : > { %v2078_v0 = vld [vmem:[%s2624_s2 + $0x38] sm:$0xff]  ;;  %v2077_v3 = vld [vmem:[%s2624_s2 + $0x30] sm:$0xff]  ;;  %v2076_v8 = vld [vmem:[%s2624_s2 + $0x28] sm:$0xff]  ;;  %s2635_s18 = smov (!%p376_p3, %s1734_s18), 1  ;;  %vm796_vm0 = vcmask 261120   ;;  %vm870_vm5 = vcmask 130048  }
   0xc   : > { %v2094_v1 = vld [vmem:[%s2624_s2 + $0xb8] sm:$0xff]  ;;  %727 = vmatpush.bf16.msra.mxu0 %v2078_v0  ;;  %v2093_v5 = vld [vmem:[%s2624_s2 + $0xb0] sm:$0xff]  ;;  %v2092_v9 = vld [vmem:[%s2624_s2 + $0xa8] sm:$0xff]  ;;  %s2141_s23 = smul.u32 20, %s2635_s18  ;;  %vm890_vm6 = vcmask 64512   ;;  %vm908_vm7 = vcmask 1043456  }
   0xd   : > { %v2102_v2 = vld [vmem:[%s2624_s2 + $0xf8] sm:$0xff]  ;;  %753 = vmatpush.bf16.msra.mxu2 %v2094_v1  ;;  %v2101_v6 = vld [vmem:[%s2624_s2 + $0xf0] sm:$0xff]  ;;  %v2100_v10 = vld [vmem:[%s2624_s2 + $0xe8] sm:$0xff]  ;;  %s1740_s16 = sshll.u32 %s2635_s18, 3 }
   0xe   : > { %v2086_v4 = vld [vmem:[%s2624_s2 + $0x78] sm:$0xff]  ;;  %766 = vmatpush.bf16.msra.mxu3 %v2102_v2  ;;  %v2085_v7 = vld [vmem:[%s2624_s2 + $0x70] sm:$0xff]  ;;  %v2084_v11 = vld [vmem:[%s2624_s2 + $0x68] sm:$0xff]  ;;  %s2350_s15 = scalar_lea.vmem %s2622_s0, %s2141_s23  ;;  %s384_s22 = scalar_lea.vmem %s2633_s11, %s1740_s16 }
   0xf   : > { %740 = vmatpush.bf16.msra.mxu1 %v2086_v4  ;;  %v2075_v12 = vld [vmem:[%s2624_s2 + $0x20] sm:$0xff]  ;;  %v2074_v16 = vld [vmem:[%s2624_s2 + $0x18] sm:$0xff]  ;;  %v2073_v20 = vld [vmem:[%s2624_s2 + $0x10] sm:$0xff] }
  0x10   : > { %728 = vmatpush.bf16.msra.mxu0 %v2077_v3  ;;  %v2091_v13 = vld [vmem:[%s2624_s2 + $0xa0] sm:$0xff]  ;;  %v2090_v17 = vld [vmem:[%s2624_s2 + $0x98] sm:$0xff]  ;;  %v2089_v21 = vld [vmem:[%s2624_s2 + $0x90] sm:$0xff] }
  0x11   : > { %754 = vmatpush.bf16.msra.mxu2 %v2093_v5  ;;  %v2099_v14 = vld [vmem:[%s2624_s2 + $0xe0] sm:$0xff]  ;;  %v2098_v18 = vld [vmem:[%s2624_s2 + $0xd8] sm:$0xff]  ;;  %v2097_v22 = vld [vmem:[%s2624_s2 + $0xd0] sm:$0xff] }
  0x12   : > { %767 = vmatpush.bf16.msra.mxu3 %v2101_v6  ;;  %v2083_v15 = vld [vmem:[%s2624_s2 + $0x60] sm:$0xff]  ;;  %v2082_v19 = vld [vmem:[%s2624_s2 + $0x58] sm:$0xff]  ;;  %v2081_v23 = vld [vmem:[%s2624_s2 + $0x50] sm:$0xff]  ;;  %v2197_v6 = vmov 32.0  }
  0x13   : > { %741 = vmatpush.bf16.msra.mxu1 %v2085_v7  ;;  %v2072_v24 = vld [vmem:[%s2624_s2 + $0x8] sm:$0xff]  ;;  %v386_v25 = vld [vmem:[%s2350_s15] sm:$0xff]  ;;  %v2110_v33 = vld [vmem:[%s2624_s2 + $0x138] sm:$0xff]  ;;  %2157 = vrcp.f32 %v2197_v6 }
  0x14   : > { %729 = vmatpush.bf16.msra.mxu0 %v2076_v8  ;;  %v2088_v26 = vld [vmem:[%s2624_s2 + $0x88] sm:$0xff]  ;;  %v472_v30 = vunpack.c.l.b16 %v386_v25  ;;  %v2071_v31 = vld [vmem:[%s2624_s2] sm:$0xff]  ;;  %v473_v38 = vunpack.c.h.b16 %v386_v25  ;;  %v2109_v41 = vld [vmem:[%s2624_s2 + $0x130] sm:$0xff] }
  0x15   : > { %755 = vmatpush.bf16.msra.mxu2 %v2092_v9  ;;  %v2096_v27 = vld [vmem:[%s2624_s2 + $0xc8] sm:$0xff]  ;;  %v2087_v34 = vld [vmem:[%s2624_s2 + $0x80] sm:$0xff]  ;;  %v2106_v46 = vld [vmem:[%s2624_s2 + $0x118] sm:$0xff] }
  0x16   : > { %768 = vmatpush.bf16.msra.mxu3 %v2100_v10  ;;  %v387_v28 = vld [vmem:[%s2350_s15 + $0x8] sm:$0xff]  ;;  %v2095_v36 = vld [vmem:[%s2624_s2 + $0xc0] sm:$0xff]  ;;  %v477_v39 = vpack.c.b16 %v472_v30, %v472_v30  ;;  %v478_v43 = vpack.c.b16 %v473_v38, %v473_v38  ;;  %v2105_v47 = vld [vmem:[%s2624_s2 + $0x110] sm:$0xff] }
  0x17   : > { %742 = vmatpush.bf16.msra.mxu1 %v2084_v11  ;;  %v2080_v29 = vld [vmem:[%s2624_s2 + $0x48] sm:$0xff]  ;;  %v474_v32 = vunpack.c.l.b16 %v387_v28  ;;  %v475_v35 = vunpack.c.h.b16 %v387_v28  ;;  %v2079_v37 = vld [vmem:[%s2624_s2 + $0x40] sm:$0xff]  ;;  %v388_v49 = vld [vmem:[%s2350_s15 + $0x10] sm:$0xf] }
  0x18   : > { %730 = vmatpush.bf16.msra.mxu0 %v2075_v12  ;;  %v2108_v44 = vld [vmem:[%s2624_s2 + $0x128] sm:$0xff]  ;;  %v2107_v45 = vld [vmem:[%s2624_s2 + $0x120] sm:$0xff]  ;;  %v476_v50 = vunpack.c.l.b16 %v388_v49 }
  0x19   : > { %756 = vmatpush.bf16.msra.mxu2 %v2091_v13  ;;  %v479_v40 = vpack.c.b16 %v474_v32, %v474_v32  ;;  %v480_v42 = vpack.c.b16 %v475_v35, %v475_v35  ;;  %v2104_v48 = vld [vmem:[%s2624_s2 + $0x108] sm:$0xff]  ;;  %v2103_v51 = vld [vmem:[%s2624_s2 + $0x100] sm:$0xff]  ;;  %v2158_v7 = vpop.eup %2157 }
  0x1a   : > { %769 = vmatpush.bf16.msra.mxu3 %v2099_v14  ;;  %v481_v52 = vpack.c.b16 %v476_v50, %v476_v50  ;;  %v792_v1 = vld [vmem:[%s2623_s1] sm:$0xff]  ;;  %v801_v8 = vmul.f32 32.0, %v2158_v7  ;;  %vm805_vm1 = vweird.f32 %v2158_v7 }
  0x1b   : > { %743 = vmatpush.bf16.msra.mxu1 %v2083_v15  ;;  %v2429_v32 = vld [vmem:[%s2630_s8] sm:$0xf] }
  0x1c   : > { %731 = vmatpush.bf16.msra.mxu0 %v2074_v16  ;;  %v802_v9 = vsub.f32 1.0, %v801_v8 }
  0x1d   : > { %757 = vmatpush.bf16.msra.mxu2 %v2090_v17 }
  0x1e   : > { %770 = vmatpush.bf16.msra.mxu3 %v2098_v18  ;;  %v803_v10 = vmul.f32 %v2158_v7, %v802_v9  ;;  %v2112_v18 = vld [vmem:[%s2626_s4 + $0x8] sm:$0xff] }
  0x1f   : > { %744 = vmatpush.bf16.msra.mxu1 %v2082_v19  ;;  %v2111_v19 = vld [vmem:[%s2626_s4] sm:$0xff] }
  0x20   : > { %732 = vmatpush.bf16.msra.mxu0 %v2073_v20  ;;  %v804_v11 = vadd.f32 %v2158_v7, %v803_v10 }
  0x21   : > { %758 = vmatpush.bf16.msra.mxu2 %v2089_v21 }
  0x22   : > { %771 = vmatpush.bf16.msra.mxu3 %v2097_v22  ;;  %v2413_v12 = vsel %vm805_vm1, %v2158_v7, %v804_v11 }
  0x23   : > { %745 = vmatpush.bf16.msra.mxu1 %v2081_v23 }
  0x24   : > { %733 = vmatpush.bf16.msra.mxu0 %v2072_v24 }
  0x25   : > { %759 = vmatpush.bf16.msra.mxu2 %v2088_v26 }
  0x26   : > { %772 = vmatpush.bf16.msra.mxu3 %v2096_v27 }
  0x27   : > { %746 = vmatpush.bf16.msra.mxu1 %v2080_v29 }
  0x28   : > { %734 = vmatpush.bf16.msra.mxu0 %v2071_v31 }
  0x29   : > { %760 = vmatpush.bf16.msra.mxu2 %v2087_v34 }
  0x2a   : > { %773 = vmatpush.bf16.msra.mxu3 %v2095_v36 }
  0x2b   : > { %747 = vmatpush.bf16.msra.mxu1 %v2079_v37  ;;  %735 = vmatmul.bf16.vlgmr.msra.gmra.mxu0 %v477_v39 }
  0x2c   : > { %779 = vmatpush.bf16.msrb.mxu0 %v2110_v33  ;;  %761 = vmatmul.bf16.vlgmr.msra.gmra.mxu2 %v479_v40  ;;  %v831_v33 = vperm.slane %v2429_v32, 0 }
  0x2d   : > { %774 = vmatmul.bf16.vlgmr.msra.gmra.mxu3 %v480_v42 }
  0x2e   : > { %748 = vmatmul.bf16.vlgmr.msra.gmra.mxu1 %v478_v43 }
  0x2f   : > { %853 = vmatpush.bf16.msrb.mxu1 %v2112_v18 }
  0x30   : > { %780 = vmatpush.bf16.msrb.mxu0 %v2109_v41 }
  0x33   : > { %854 = vmatpush.bf16.msrb.mxu1 %v2111_v19 }
  0x34   : > { %781 = vmatpush.bf16.msrb.mxu0 %v2108_v44 }
  0x38   : > { %782 = vmatpush.bf16.msrb.mxu0 %v2107_v45  ;;  %v2442_v45 = vld [vmem:[%s2625_s3] sm:$0xff] }
  0x3c   : > { %783 = vmatpush.bf16.msrb.mxu0 %v2106_v46 }
  0x40   : > { %784 = vmatpush.bf16.msrb.mxu0 %v2105_v47 }
  0x44   : > { %785 = vmatpush.bf16.msrb.mxu0 %v2104_v48 }
  0x48   : > { %786 = vmatpush.bf16.msrb.mxu0 %v2103_v51 }
  0x4b   : > { %787 = vmatmul.bf16.vlgmr.msrb.gmra.mxu0 %v481_v52 }
  0xa8   : > { %v736_v53 = vpop.f32.mrf.mxu0 }
  0xab   : > { %v749_v54 = vpop.f32.mrf.mxu1 }
  0xac   : > { %v750_v61 = vadd.f32 %v749_v54, %v736_v53 }
  0xaf   : > { %v762_v55 = vpop.f32.mrf.mxu2 }
  0xb0   : > { %v738_v56 = vpop.f32.mrf.mxu0  ;;  %v775_v57 = vpop.f32.mrf.mxu3  ;;  %v763_v62 = vadd.f32 %v762_v55, %v750_v61 }
  0xb2   : > { %v776_v63 = vadd.f32 %v775_v57, %v763_v62 }
  0xb3   : > { %v751_v58 = vpop.f32.mrf.mxu1 }
  0xb7   : > { %v764_v59 = vpop.f32.mrf.mxu2 }
  0xb8   : > { %v777_v60 = vpop.f32.mrf.mxu3 }
  0xc8   : > { %v788_v0 = vpop.f32.mrf.mxu0 }
  0xc9   : > { %v789_v2 = vadd.f32 %v788_v0, %v776_v63 }
  0xcb   : > { %v2409_v3 = vadd.f32 %v792_v1, %v789_v2 }
  0xcd   : > { %v797_v4 = vsel %vm796_vm0, %v2409_v3, 0.0 }
  0xce   : > { %798 = vadd.xlane.f32.xlu0 %v797_v4 }
  0xd0   : > { %v790_v5 = vpop.f32.mrf.mxu0 }
 0x141   : > { %v799_v13 = vpop.xlane.xlu0 %798 }
 0x142   : > { %v807_v14 = vmul.f32 %v2413_v12, %v799_v13 }
 0x144   : > { %v808_v15 = vsub.f32 %v2409_v3, %v807_v14  ;;  %v2114_v14 = vld [vmem:[%s2627_s5 + $0x8] sm:$0xff] }
 0x146   : > { %v809_v16 = vmul.f32 %v808_v15, %v808_v15 }
 0x148   : > { %v810_v17 = vsel %vm796_vm0, %v809_v16, 0.0 }
 0x149   : > { %811 = vadd.xlane.f32.xlu0 %v810_v17 }
 0x1bc   : > { %v812_v20 = vpop.xlane.xlu0 %811 }
 0x1bd   : > { %v813_v21 = vmul.f32 %v812_v20, %v2413_v12 }
 0x1bf   : > { %v814_v22 = vadd.f32 1e-06, %v813_v21 }
 0x1c1   : > { %2159 = vrsqrt.f32 %v814_v22  ;;  %vm821_vm3 = vweird.f32 %v814_v22 }
 0x1c7   : > { %v2160_v23 = vpop.eup %2159 }
 0x1c8   : > { %v816_v24 = vmul.f32 %v2160_v23, %v814_v22  ;;  %vm822_vm2 = vweird.f32 %v2160_v23 }
 0x1c9   : > { %vm823_vm4 = vmor %vm821_vm3, %vm822_vm2 }
 0x1ca   : > { %v817_v25 = vmul.f32 %v2160_v23, %v816_v24 }
 0x1cc   : > { %v818_v26 = vmul.f32 0.5, %v817_v25 }
 0x1ce   : > { %v819_v27 = vsub.f32 1.5, %v818_v26  ;;  %v1029_v26 = vperm.slane %v2429_v32, 1 }
 0x1d0   : > { %v820_v28 = vmul.f32 %v2160_v23, %v819_v27 }
 0x1d2   : > { %v824_v29 = vsel %vm823_vm4, %v2160_v23, %v820_v28 }
 0x1d3   : > { %v825_v30 = vmul.f32 %v824_v29, %v808_v15  ;;  %v2113_v15 = vld [vmem:[%s2627_s5] sm:$0xff] }
 0x1d5   : > { %v826_v31 = vpack.c.bf16 %v825_v30, %v825_v30 }
 0x1d7   : > { %1909 = vmatmul.msk.bf16.vlgmr.msrb.gmra.mxu1 %vm796_vm0, %v826_v31 }
 0x254   : > { %v856_v34 = vpop.f32.mrf.mxu1 }
 0x255   : > { %v857_v35 = vadd.f32 %v856_v34, %v831_v33 }
 0x257   : > { %v866_v36 = vpack.c.bf16 %v857_v35, %v857_v35  ;;  %v864_v37 = vmul.f32 0.25, %v857_v35 }
 0x259   : > { %868 = vrot.lane.b32.xlu1 %v866_v36, %s2198_s27  ;;  %v865_v38 = vpack.c.bf16 %v864_v37, %v864_v37  ;;  %v2115_v37 = vld [vmem:[%s2628_s6] sm:$0xff] }
 0x25b   : > { %927 = vrot.lane.b32.xlu2 %v865_v38, %s2199_s28 }
 0x25c   : > { %v858_v39 = vpop.f32.mrf.mxu1 }
 0x261   : > { %929 = vrot.lane.b32.xlu1 %v866_v36, %s2200_s29 }
 0x2b5   : > { %v928_v44 = vpop.permute.xlu2 %927 }
 0x2cb   : > { %v869_v40 = vpop.permute.xlu1 %868 }
 0x2cc   : > { %v875_v41 = vsel %vm870_vm5, %v869_v40, 0 }
 0x2cd   : > { %884 = vmatpush.bf16.xpose.msrb.mxu2 %v875_v41 }
 0x2d3   : > { %v930_v42 = vpop.permute.xlu1 %929 }
 0x2d4   : > { %v935_v43 = vsel %vm870_vm5, %v930_v42, 0  ;;  %1910 = vmatmul.msk.bf16.vlgmr.msrb.gmra.mxu2 %vm870_vm5, %v865_v38 }
 0x2d5   : > { %944 = vmatpush.bf16.xpose.msra.mxu1 %v935_v43 }
 0x2dc   : > { %1912 = vmatmul.msk.bf16.vlgmr.msra.gmra.mxu1 %vm870_vm5, %v928_v44 }
 0x357   : > { %v886_v46 = vpop.f32.mrf.mxu2 }
 0x358   : > { %v887_v47 = vadd.f32 %v886_v46, %v2442_v45 }
 0x359   : > { %v946_v48 = vpop.f32.mrf.mxu1 }
 0x35a   : > { %v947_v49 = vadd.f32 %v946_v48, %v2442_v45  ;;  %v891_v50 = vsel %vm890_vm6, %v887_v47, -inf }
 0x35b   : > { %892 = vmax.xlane.f32.xlu2 %v891_v50 }
 0x35c   : > { %v950_v51 = vsel %vm890_vm6, %v947_v49, -inf }
 0x35d   : > { %951 = vmax.xlane.f32.xlu0 %v950_v51  ;;  %v2124_v51 = vld [vmem:[%s2629_s7 + $0x38] sm:$0xff] }
 0x35f   : > { %v888_v52 = vpop.f32.mrf.mxu2 }
 0x360   : > { %v2123_v52 = vld [vmem:[%s2629_s7 + $0x30] sm:$0xff] }
 0x361   : > { %v948_v53 = vpop.f32.mrf.mxu1 }
 0x362   : > { %v1058_v53 = vperm.slane %v2429_v32, 2 }
 0x373   : > { %962 = vrot.lane.b32.xlu2 %v866_v36, %s2201_s13 }
 0x3ce   : > { %v893_v54 = vpop.xlane.xlu2 %892 }
 0x3cf   : > { %v894_v55 = vsub.f32 %v887_v47, %v893_v54 }
 0x3d0   : > { %v952_v56 = vpop.xlane.xlu0 %951 }
 0x3d1   : > { %v895_v57 = vmul.f32 1.442695, %v894_v55  ;;  %v953_v58 = vsub.f32 %v947_v49, %v952_v56  ;;  %v2122_v55 = vld [vmem:[%s2629_s7 + $0x28] sm:$0xff] }
 0x3d3   : > { %2161 = vpow2.f32 %v895_v57  ;;  %v954_v59 = vmul.f32 1.442695, %v953_v58  ;;  %v2121_v58 = vld [vmem:[%s2629_s7 + $0x20] sm:$0xff] }
 0x3d5   : > { %2163 = vpow2.f32 %v954_v59 }
 0x3d6   : > { %v963_v60 = vpop.permute.xlu2 %962 }
 0x3d7   : > { %v968_v61 = vsel %vm908_vm7, %v963_v60, 0 }
 0x3d8   : > { %977 = vmatpush.bf16.msra.mxu2 %v968_v61 }
 0x3d9   : > { %v2162_v62 = vpop.eup %2161 }
 0x3da   : > { %v897_v63 = vsel %vm890_vm6, %v2162_v62, 0.0 }
 0x3db   : > { %v2164_v0 = vpop.eup %2163  ;;  %898 = vadd.xlane.f32.xlu1 %v897_v63 }
 0x3dc   : > { %v956_v1 = vsel %vm890_vm6, %v2164_v0, 0.0  ;;  %1022 = vmatpush.bf16.msrb.mxu2 %v2113_v15 }
 0x3dd   : > { %957 = vadd.xlane.f32.xlu0 %v956_v1 }
 0x3f1   : > { %903 = vrot.lane.b32.xlu0 %v866_v36, %s2202_s14 }
 0x44e   : > { %v899_v4 = vpop.xlane.xlu1 %898 }
 0x450   : > { %v958_v2 = vpop.xlane.xlu0 %957 }
 0x451   : > { %2165 = vrcp.f32 %v958_v2 }
 0x452   : > { %2167 = vrcp.f32 %v899_v4  ;;  %v2119_v4 = vld [vmem:[%s2629_s7 + $0x10] sm:$0xff] }
 0x457   : > { %v2166_v5 = vpop.eup %2165 }
 0x458   : > { %v960_v6 = vmul.f32 %v2166_v5, %v2164_v0  ;;  %v2168_v8 = vpop.eup %2167 }
 0x459   : > { %v901_v9 = vmul.f32 %v2168_v8, %v2162_v62  ;;  %v2120_v62 = vld [vmem:[%s2629_s7 + $0x18] sm:$0xff] }
 0x45a   : > { %v961_v7 = vpack.c.bf16 %v960_v6, %v960_v6 }
 0x45b   : > { %v902_v13 = vpack.c.bf16 %v901_v9, %v901_v9  ;;  %v2118_v9 = vld [vmem:[%s2629_s7 + $0x8] sm:$0xff] }
 0x45c   : > { %1913 = vmatmul.msk.bf16.vlgmr.msra.gmra.mxu2 %vm890_vm6, %v961_v7 }
 0x45d   : > { %1197 = vmatpush.bf16.msra.mxu2 %v2124_v51 }
 0x461   : > { %1198 = vmatpush.bf16.msra.mxu2 %v2123_v52 }
 0x463   : > { %v904_v10 = vpop.permute.xlu0 %903 }
 0x464   : > { %v910_v11 = vsel %vm908_vm7, %v904_v10, 0 }
 0x465   : > { %919 = vmatpush.bf16.msrb.mxu3 %v910_v11  ;;  %1199 = vmatpush.bf16.msra.mxu2 %v2122_v55 }
 0x468   : > { %1911 = vmatmul.msk.bf16.vlgmr.msrb.gmra.mxu3 %vm890_vm6, %v902_v13 }
 0x469   : > { %1000 = vmatpush.bf16.msra.mxu3 %v2114_v14  ;;  %1200 = vmatpush.bf16.msra.mxu2 %v2121_v58  ;;  %v2117_v14 = vld [vmem:[%s2629_s7] sm:$0xff] }
 0x46d   : > { %1201 = vmatpush.bf16.msra.mxu2 %v2120_v62 }
 0x471   : > { %1202 = vmatpush.bf16.msra.mxu2 %v2119_v4 }
 0x475   : > { %1203 = vmatpush.bf16.msra.mxu2 %v2118_v9 }
 0x479   : > { %1204 = vmatpush.bf16.msra.mxu2 %v2117_v14 }
 0x4df   : > { %v979_v16 = vpop.f32.mrf.mxu2 }
 0x4e0   : > { %v983_v17 = vpack.c.bf16 %v979_v16, %v979_v16 }
 0x4e2   : > { %1918 = vmatmul.msk.bf16.vlgmr.msra.gmra.mxu3 %vm870_vm5, %v983_v17 }
 0x4e7   : > { %v981_v18 = vpop.f32.mrf.mxu2 }
 0x4eb   : > { %v921_v19 = vpop.f32.mrf.mxu3 }
 0x4ec   : > { %v925_v20 = vpack.c.bf16 %v921_v19, %v921_v19 }
 0x4ee   : > { %1923 = vmatmul.msk.bf16.vlgmr.msrb.gmra.mxu2 %vm870_vm5, %v925_v20 }
 0x4f3   : > { %v923_v21 = vpop.f32.mrf.mxu3 }
 0x565   : > { %v1002_v22 = vpop.f32.mrf.mxu3 }
 0x56d   : > { %v1004_v23 = vpop.f32.mrf.mxu3 }
 0x571   : > { %v1024_v24 = vpop.f32.mrf.mxu2 }
 0x572   : > { %v1025_v25 = vadd.f32 %v1024_v24, %v1002_v22 }
 0x574   : > { %v1028_v27 = vadd.f32 %v1025_v25, %v2409_v3  ;;  %v2116_v3 = vld [vmem:[%s2628_s6 + $0x8] sm:$0xff] }
 0x575   : > { %1080 = vmatpush.bf16.msrb.mxu1 %v2116_v3 }
 0x576   : > { %v2466_v28 = vadd.f32 %v1029_v26, %v1028_v27 }
 0x578   : > { %v1031_v29 = vsel %vm796_vm0, %v2466_v28, 0.0 }
 0x579   : > { %v1026_v30 = vpop.f32.mrf.mxu2  ;;  %1032 = vadd.xlane.f32.xlu0 %v1031_v29  ;;  %1081 = vmatpush.bf16.msrb.mxu1 %v2115_v37 }
 0x5ec   : > { %v1033_v31 = vpop.xlane.xlu0 %1032 }
 0x5ed   : > { %v1034_v33 = vmul.f32 %v1033_v31, %v2413_v12 }
 0x5ef   : > { %v1035_v34 = vsub.f32 %v2466_v28, %v1034_v33 }
 0x5f1   : > { %v1036_v35 = vmul.f32 %v1035_v34, %v1035_v34 }
 0x5f3   : > { %v1037_v36 = vsel %vm796_vm0, %v1036_v35, 0.0 }
 0x5f4   : > { %1038 = vadd.xlane.f32.xlu1 %v1037_v36 }
 0x667   : > { %v1039_v38 = vpop.xlane.xlu1 %1038 }
 0x668   : > { %v1040_v39 = vmul.f32 %v1039_v38, %v2413_v12 }
 0x66a   : > { %v1041_v40 = vadd.f32 1e-06, %v1040_v39 }
 0x66c   : > { %2169 = vrsqrt.f32 %v1041_v40  ;;  %vm1048_vm9 = vweird.f32 %v1041_v40 }
 0x672   : > { %v2170_v41 = vpop.eup %2169 }
 0x673   : > { %v1043_v42 = vmul.f32 %v2170_v41, %v1041_v40  ;;  %vm1049_vm8 = vweird.f32 %v2170_v41 }
 0x674   : > { %vm1050_vm10 = vmor %vm1048_vm9, %vm1049_vm8 }
 0x675   : > { %v1044_v43 = vmul.f32 %v2170_v41, %v1043_v42  ;;  %v1148_v42 = vperm.slane %v2429_v32, 3  ;;  %v2126_v32 = vld [vmem:[%s2626_s4 + $0x18] sm:$0xff] }
 0x676   : > { %1263 = vmatpush.bf16.msrb.mxu3 %v2126_v32 }
 0x677   : > { %v1045_v44 = vmul.f32 0.5, %v1044_v43 }
 0x679   : > { %v1046_v46 = vsub.f32 1.5, %v1045_v44 }
 0x67b   : > { %v1047_v47 = vmul.f32 %v2170_v41, %v1046_v46 }
 0x67d   : > { %v1051_v48 = vsel %vm1050_vm10, %v2170_v41, %v1047_v47 }
 0x67e   : > { %v1052_v49 = vmul.f32 %v1051_v48, %v1035_v34 }
 0x680   : > { %v1053_v50 = vpack.c.bf16 %v1052_v49, %v1052_v49 }
 0x682   : > { %1932 = vmatmul.msk.bf16.vlgmr.msrb.gmra.mxu1 %vm796_vm0, %v1053_v50 }
 0x6ff   : > { %v1083_v54 = vpop.f32.mrf.mxu1 }
 0x700   : > { %v1084_v56 = vadd.f32 %v1083_v54, %v1058_v53 }
 0x702   : > { %v1088_v57 = vmul.f32 0.70710677, %v1084_v56  ;;  %v1087_v38 = vmul.f32 0.5, %v1084_v56 }
 0x704   : > { %v1089_v59 = vmul.f32 %v1088_v57, %v1088_v57 }
 0x706   : > { %v1090_v60 = vmin.f32 %v1089_v59, 16.0 }
 0x707   : > { %v1085_v61 = vpop.f32.mrf.mxu1 }
 0x708   : > { %v1091_v63 = vmul.f32 2.1237322e-06, %v1090_v60  ;;  %v1102_v0 = vmul.f32 3.8918573e-05, %v1090_v60 }
 0x70a   : > { %v1092_v1 = vadd.f32 0.00028619796, %v1091_v63  ;;  %v1103_v2 = vadd.f32 0.001143296, %v1102_v0 }
 0x70c   : > { %v1093_v5 = vmul.f32 %v1092_v1, %v1090_v60  ;;  %v1104_v6 = vmul.f32 %v1103_v2, %v1090_v60  ;;  %v2526_v2 = vld [vmem:[%s2630_s8 + $0x4] sm:$0xf] }
 0x70d   : > { %v1241_v4 = vperm.slane %v2526_v2, 0 }
 0x70e   : > { %v1105_v7 = vadd.f32 0.014752088, %v1104_v6  ;;  %v1094_v8 = vadd.f32 0.0036580483, %v1093_v5 }
 0x710   : > { %v1106_v10 = vmul.f32 %v1105_v7, %v1090_v60  ;;  %v1095_v13 = vmul.f32 %v1094_v8, %v1090_v60 }
 0x712   : > { %v1107_v11 = vadd.f32 0.112945676, %v1106_v10  ;;  %v1096_v17 = vadd.f32 0.05243302, %v1095_v13 }
 0x714   : > { %v1108_v15 = vmul.f32 %v1107_v11, %v1090_v60  ;;  %v1097_v20 = vmul.f32 %v1096_v17, %v1090_v60 }
 0x716   : > { %v1109_v16 = vadd.f32 0.4994258, %v1108_v15  ;;  %v1098_v21 = vadd.f32 0.18741608, %v1097_v20 }
 0x718   : > { %v1110_v18 = vmul.f32 %v1109_v16, %v1090_v60  ;;  %v1099_v23 = vmul.f32 %v1098_v21, %v1090_v60 }
 0x71a   : > { %v1111_v19 = vadd.f32 1.0, %v1110_v18  ;;  %v1100_v27 = vadd.f32 1.1283791, %v1099_v23 }
 0x71c   : > { %2171 = vrcp.f32 %v1111_v19  ;;  %v1123_v26 = vand.u32 2147483648, %v1111_v19  ;;  %v1121_v30 = vand.u32 2147483647, %v1111_v19  ;;  %vm1117_vm12 = vweird.f32 %v1111_v19 }
 0x71d   : > { %v1101_v34 = vmul.f32 %v1100_v27, %v1088_v57 }
 0x71e   : > { %v1124_v33 = vor.u32 1.1754944e-38, %v1123_v26  ;;  %vm1122_vm14 = vcmp.eq.f32.partialorder %v1121_v30, 8.507059e+37 }
 0x722   : > { %v2172_v22 = vpop.eup %2171 }
 0x723   : > { %v1113_v24 = vmul.f32 %v2172_v22, %v1111_v19  ;;  %vm1118_vm11 = vweird.f32 %v2172_v22 }
 0x724   : > { %vm1119_vm13 = vmor %vm1117_vm12, %vm1118_vm11 }
 0x725   : > { %v1114_v25 = vsub.f32 1.0, %v1113_v24 }
 0x727   : > { %v1115_v29 = vmul.f32 %v2172_v22, %v1114_v25 }
 0x729   : > { %v1116_v31 = vadd.f32 %v2172_v22, %v1115_v29 }
 0x72b   : > { %v1120_v35 = vsel %vm1119_vm13, %v2172_v22, %v1116_v31 }
 0x72c   : > { %v1125_v36 = vsel %vm1122_vm14, %v1124_v33, %v1120_v35 }
 0x72d   : > { %v1126_v3 = vmul.f32 %v1125_v36, %v1101_v34 }
 0x72f   : > { %v1933_v37 = vclamps-f32 %v1126_v3, 1.0 }
 0x731   : > { %v1129_v39 = vadd.f32 1.0, %v1933_v37 }
 0x733   : > { %v1130_v40 = vmul.f32 %v1129_v39, %v1087_v38 }
 0x735   : > { %v1131_v41 = vpack.c.bf16 %v1130_v40, %v1130_v40 }
 0x737   : > { %1205 = vmatmul.bf16.vlgmr.msra.gmra.mxu2 %v1131_v41 }
 0x7ba   : > { %v1206_v43 = vpop.f32.mrf.mxu2 }
 0x7bb   : > { %v1207_v44 = vadd.f32 %v1206_v43, %v1148_v42 }
 0x7bd   : > { %v2508_v46 = vadd.f32 %v1207_v44, %v2466_v28  ;;  %v2125_v28 = vld [vmem:[%s2626_s4 + $0x10] sm:$0xff] }
 0x7be   : > { %1264 = vmatpush.bf16.msrb.mxu3 %v2125_v28 }
 0x7bf   : > { %v1213_v47 = vsel %vm796_vm0, %v2508_v46, 0.0 }
 0x7c0   : > { %1214 = vadd.xlane.f32.xlu1 %v1213_v47 }
 0x7c2   : > { %v1208_v48 = vpop.f32.mrf.mxu2 }
 0x833   : > { %v1215_v49 = vpop.xlane.xlu1 %1214 }
 0x834   : > { %v1216_v50 = vmul.f32 %v1215_v49, %v2413_v12  ;;  %v2128_v49 = vld [vmem:[%s2627_s5 + $0x18] sm:$0xff] }
 0x836   : > { %v1217_v51 = vsub.f32 %v2508_v46, %v1216_v50  ;;  %v2127_v50 = vld [vmem:[%s2627_s5 + $0x10] sm:$0xff] }
 0x837   : > { %1430 = vmatpush.bf16.msrb.mxu2 %v2127_v50 }
 0x838   : > { %v1218_v52 = vmul.f32 %v1217_v51, %v1217_v51 }
 0x83a   : > { %v1219_v53 = vsel %vm796_vm0, %v1218_v52, 0.0 }
 0x83b   : > { %1220 = vadd.xlane.f32.xlu2 %v1219_v53 }
 0x8ae   : > { %v1221_v54 = vpop.xlane.xlu2 %1220 }
 0x8af   : > { %v1222_v55 = vmul.f32 %v1221_v54, %v2413_v12 }
 0x8b1   : > { %v1223_v56 = vadd.f32 1e-06, %v1222_v55 }
 0x8b3   : > { %2173 = vrsqrt.f32 %v1223_v56  ;;  %vm1230_vm1 = vweird.f32 %v1223_v56 }
 0x8b9   : > { %v2174_v57 = vpop.eup %2173 }
 0x8ba   : > { %v1225_v58 = vmul.f32 %v2174_v57, %v1223_v56  ;;  %vm1231_vm15 = vweird.f32 %v2174_v57 }
 0x8bb   : > { %vm1232_vm2 = vmor %vm1230_vm1, %vm1231_vm15 }
 0x8bc   : > { %v1226_v59 = vmul.f32 %v2174_v57, %v1225_v58  ;;  %v1437_v58 = vperm.slane %v2526_v2, 1 }
 0x8be   : > { %v1227_v60 = vmul.f32 0.5, %v1226_v59 }
 0x8c0   : > { %v1228_v61 = vsub.f32 1.5, %v1227_v60 }
 0x8c2   : > { %v1229_v62 = vmul.f32 %v2174_v57, %v1228_v61 }
 0x8c4   : > { %v1233_v63 = vsel %vm1232_vm2, %v2174_v57, %v1229_v62 }
 0x8c5   : > { %v1234_v0 = vmul.f32 %v1233_v63, %v1217_v51 }
 0x8c7   : > { %v1235_v1 = vpack.c.bf16 %v1234_v0, %v1234_v0 }
 0x8c9   : > { %1979 = vmatmul.msk.bf16.vlgmr.msrb.gmra.mxu3 %vm796_vm0, %v1235_v1 }
 0x94c   : > { %v1266_v5 = vpop.f32.mrf.mxu3 }
 0x94d   : > { %v1267_v6 = vadd.f32 %v1266_v5, %v1241_v4 }
 0x94f   : > { %v1277_v7 = vpack.c.bf16 %v1267_v6, %v1267_v6  ;;  %v1275_v8 = vmul.f32 0.25, %v1267_v6 }
 0x951   : > { %1337 = vrot.lane.b32.xlu0 %v1277_v7, %s2200_s29  ;;  %1279 = vrot.lane.b32.xlu1 %v1277_v7, %s2198_s27  ;;  %v1276_v10 = vpack.c.bf16 %v1275_v8, %v1275_v8 }
 0x954   : > { %v1268_v9 = vpop.f32.mrf.mxu3 }
 0x959   : > { %1335 = vrot.lane.b32.xlu1 %v1276_v10, %s2199_s28 }
 0x9c3   : > { %v1338_v11 = vpop.permute.xlu0 %1337  ;;  %v1280_v13 = vpop.permute.xlu1 %1279 }
 0x9c4   : > { %v1343_v14 = vsel %vm870_vm5, %v1338_v11, 0  ;;  %v1285_v15 = vsel %vm870_vm5, %v1280_v13, 0 }
 0x9c5   : > { %1294 = vmatpush.bf16.xpose.msra.mxu0 %v1285_v15  ;;  %1352 = vmatpush.bf16.xpose.msra.mxu3 %v1343_v14 }
 0x9cb   : > { %v1336_v16 = vpop.permute.xlu1 %1335 }
 0x9cc   : > { %1984 = vmatmul.msk.bf16.vlgmr.msra.gmra.mxu0 %vm870_vm5, %v1276_v10  ;;  %1986 = vmatmul.msk.bf16.vlgmr.msra.gmra.mxu3 %vm870_vm5, %v1336_v16 }
 0xa49   : > { %v1296_v17 = vpop.f32.mrf.mxu0 }
 0xa4a   : > { %v1297_v18 = vadd.f32 %v1296_v17, %v2442_v45 }
 0xa4c   : > { %v1300_v19 = vsel %vm890_vm6, %v1297_v18, -inf }
 0xa4d   : > { %1301 = vmax.xlane.f32.xlu1 %v1300_v19 }
 0xa4f   : > { %v1354_v20 = vpop.f32.mrf.mxu3 }
 0xa50   : > { %v1355_v21 = vadd.f32 %v1354_v20, %v2442_v45 }
 0xa51   : > { %v1298_v22 = vpop.f32.mrf.mxu0 }
 0xa52   : > { %v1358_v23 = vsel %vm890_vm6, %v1355_v21, -inf  ;;  %v2137_v22 = vld [vmem:[%s2629_s7 + $0x70] sm:$0xff] }
 0xa53   : > { %1359 = vmax.xlane.f32.xlu0 %v1358_v23  ;;  %v1467_v23 = vperm.slane %v2526_v2, 2 }
 0xa57   : > { %v1356_v24 = vpop.f32.mrf.mxu3 }
 0xa66   : > { %1370 = vrot.lane.b32.xlu1 %v1277_v7, %s2201_s13 }
 0xac0   : > { %v1302_v25 = vpop.xlane.xlu1 %1301 }
 0xac1   : > { %v1303_v26 = vsub.f32 %v1297_v18, %v1302_v25  ;;  %v2136_v25 = vld [vmem:[%s2629_s7 + $0x68] sm:$0xff] }
 0xac3   : > { %v1304_v27 = vmul.f32 1.442695, %v1303_v26 }
 0xac5   : > { %2175 = vpow2.f32 %v1304_v27 }
 0xac6   : > { %v1360_v29 = vpop.xlane.xlu0 %1359 }
 0xac7   : > { %v1361_v30 = vsub.f32 %v1355_v21, %v1360_v29  ;;  %v2138_v21 = vld [vmem:[%s2629_s7 + $0x78] sm:$0xff]  ;;  %v2135_v29 = vld [vmem:[%s2629_s7 + $0x60] sm:$0xff] }
 0xac9   : > { %v1362_v31 = vmul.f32 1.442695, %v1361_v30 }
 0xacb   : > { %v2176_v33 = vpop.eup %2175  ;;  %2177 = vpow2.f32 %v1362_v31 }
 0xacc   : > { %v1306_v34 = vsel %vm890_vm6, %v2176_v33, 0.0 }
 0xacd   : > { %1307 = vadd.xlane.f32.xlu2 %v1306_v34  ;;  %v2134_v34 = vld [vmem:[%s2629_s7 + $0x58] sm:$0xff] }
 0xad1   : > { %v2178_v45 = vpop.eup %2177 }
 0xad2   : > { %v1364_v35 = vsel %vm890_vm6, %v2178_v45, 0.0 }
 0xad5   : > { %1365 = vadd.xlane.f32.xlu2 %v1364_v35 }
 0xad8   : > { %v1371_v36 = vpop.permute.xlu1 %1370 }
 0xad9   : > { %v1376_v3 = vsel %vm908_vm7, %v1371_v36, 0 }
 0xada   : > { %1385 = vmatpush.bf16.msrb.mxu0 %v1376_v3 }
 0xade   : > { %1607 = vmatpush.bf16.msra.mxu0 %v2138_v21 }
 0xae2   : > { %1608 = vmatpush.bf16.msra.mxu0 %v2137_v22 }
 0xae6   : > { %1609 = vmatpush.bf16.msra.mxu0 %v2136_v25 }
 0xaea   : > { %1610 = vmatpush.bf16.msra.mxu0 %v2135_v29 }
 0xaed   : > { %1312 = vrot.lane.b32.xlu2 %v1277_v7, %s2202_s14  ;;  %v2129_v7 = vld [vmem:[%s2628_s6 + $0x10] sm:$0xff] }
 0xaee   : > { %1611 = vmatpush.bf16.msra.mxu0 %v2134_v34 }
 0xb40   : > { %v1308_v37 = vpop.xlane.xlu2 %1307 }
 0xb41   : > { %2179 = vrcp.f32 %v1308_v37  ;;  %v2133_v37 = vld [vmem:[%s2629_s7 + $0x50] sm:$0xff] }
 0xb42   : > { %1612 = vmatpush.bf16.msra.mxu0 %v2133_v37 }
 0xb47   : > { %v2180_v39 = vpop.eup %2179 }
 0xb48   : > { %v1366_v38 = vpop.xlane.xlu2 %1365  ;;  %v1310_v41 = vmul.f32 %v2180_v39, %v2176_v33 }
 0xb49   : > { %2181 = vrcp.f32 %v1366_v38 }
 0xb4a   : > { %v1311_v48 = vpack.c.bf16 %v1310_v41, %v1310_v41 }
 0xb4f   : > { %v2182_v40 = vpop.eup %2181 }
 0xb50   : > { %v1368_v42 = vmul.f32 %v2182_v40, %v2178_v45  ;;  %v1313_v43 = vpop.permute.xlu2 %1312 }
 0xb51   : > { %v1318_v44 = vsel %vm908_vm7, %v1313_v43, 0 }
 0xb52   : > { %v1369_v47 = vpack.c.bf16 %v1368_v42, %v1368_v42  ;;  %1327 = vmatpush.bf16.msra.mxu1 %v1318_v44  ;;  %v2132_v42 = vld [vmem:[%s2629_s7 + $0x48] sm:$0xff] }
 0xb53   : > { %1613 = vmatpush.bf16.msra.mxu0 %v2132_v42 }
 0xb54   : > { %1987 = vmatmul.msk.bf16.vlgmr.msrb.gmra.mxu0 %vm890_vm6, %v1369_v47 }
 0xb55   : > { %1985 = vmatmul.msk.bf16.vlgmr.msra.gmra.mxu1 %vm890_vm6, %v1311_v48  ;;  %v2131_v48 = vld [vmem:[%s2629_s7 + $0x40] sm:$0xff] }
 0xb56   : > { %1408 = vmatpush.bf16.msrb.mxu1 %v2128_v49 }
 0xb57   : > { %1614 = vmatpush.bf16.msra.mxu0 %v2131_v48 }
 0xbd1   : > { %v1387_v51 = vpop.f32.mrf.mxu0 }
 0xbd2   : > { %v1391_v52 = vpack.c.bf16 %v1387_v51, %v1387_v51  ;;  %v1329_v53 = vpop.f32.mrf.mxu1 }
 0xbd3   : > { %v1333_v32 = vpack.c.bf16 %v1329_v53, %v1329_v53 }
 0xbd4   : > { %1992 = vmatmul.msk.bf16.vlgmr.msrb.gmra.mxu1 %vm870_vm5, %v1391_v52 }
 0xbd5   : > { %1997 = vmatmul.msk.bf16.vlgmr.msrb.gmra.mxu2 %vm870_vm5, %v1333_v32 }
 0xbd9   : > { %v1389_v28 = vpop.f32.mrf.mxu0 }
 0xbda   : > { %v1331_v54 = vpop.f32.mrf.mxu1 }
 0xc51   : > { %v1410_v55 = vpop.f32.mrf.mxu1 }
 0xc58   : > { %v1432_v56 = vpop.f32.mrf.mxu2 }
 0xc59   : > { %v1433_v57 = vadd.f32 %v1432_v56, %v1410_v55  ;;  %v1412_v59 = vpop.f32.mrf.mxu1 }
 0xc5b   : > { %v1436_v60 = vadd.f32 %v1433_v57, %v2508_v46  ;;  %v2130_v46 = vld [vmem:[%s2628_s6 + $0x18] sm:$0xff] }
 0xc5c   : > { %1489 = vmatpush.bf16.msrb.mxu3 %v2130_v46 }
 0xc5d   : > { %v2558_v61 = vadd.f32 %v1437_v58, %v1436_v60 }
 0xc5f   : > { %v1439_v62 = vsel %vm796_vm0, %v2558_v61, 0.0 }
 0xc60   : > { %v1434_v63 = vpop.f32.mrf.mxu2  ;;  %1440 = vadd.xlane.f32.xlu2 %v1439_v62  ;;  %1490 = vmatpush.bf16.msrb.mxu3 %v2129_v7 }
 0xcd3   : > { %v1441_v0 = vpop.xlane.xlu2 %1440 }
 0xcd4   : > { %v1442_v1 = vmul.f32 %v1441_v0, %v2413_v12 }
 0xcd6   : > { %v1443_v4 = vsub.f32 %v2558_v61, %v1442_v1 }
 0xcd8   : > { %v1444_v5 = vmul.f32 %v1443_v4, %v1443_v4 }
 0xcda   : > { %v1445_v6 = vsel %vm796_vm0, %v1444_v5, 0.0 }
 0xcdb   : > { %1446 = vadd.xlane.f32.xlu0 %v1445_v6 }
 0xd4e   : > { %v1447_v8 = vpop.xlane.xlu0 %1446 }
 0xd4f   : > { %v1448_v9 = vmul.f32 %v1447_v8, %v2413_v12 }
 0xd51   : > { %v1449_v10 = vadd.f32 1e-06, %v1448_v9 }
 0xd53   : > { %2183 = vrsqrt.f32 %v1449_v10  ;;  %vm1456_vm4 = vweird.f32 %v1449_v10 }
 0xd59   : > { %v2184_v11 = vpop.eup %2183 }
 0xd5a   : > { %v1451_v13 = vmul.f32 %v2184_v11, %v1449_v10  ;;  %vm1457_vm3 = vweird.f32 %v2184_v11 }
 0xd5b   : > { %vm1458_vm6 = vmor %vm1456_vm4, %vm1457_vm3 }
 0xd5c   : > { %v1452_v14 = vmul.f32 %v2184_v11, %v1451_v13 }
 0xd5e   : > { %v1453_v15 = vmul.f32 0.5, %v1452_v14 }
 0xd60   : > { %v1454_v16 = vsub.f32 1.5, %v1453_v15 }
 0xd62   : > { %v1455_v17 = vmul.f32 %v2184_v11, %v1454_v16 }
 0xd64   : > { %v1459_v18 = vsel %vm1458_vm6, %v2184_v11, %v1455_v17  ;;  %v1558_v11 = vperm.slane %v2526_v2, 3  ;;  %v2140_v2 = vld [vmem:[%s2631_s9 + $0x8] sm:$0xff] }
 0xd65   : > { %v1460_v19 = vmul.f32 %v1459_v18, %v1443_v4  ;;  %1673 = vmatpush.bf16.msra.mxu1 %v2140_v2 }
 0xd67   : > { %v1461_v20 = vpack.c.bf16 %v1460_v19, %v1460_v19 }
 0xd69   : > { %2010 = vmatmul.msk.bf16.vlgmr.msrb.gmra.mxu3 %vm796_vm0, %v1461_v20 }
 0xdec   : > { %v1492_v24 = vpop.f32.mrf.mxu3 }
 0xded   : > { %v1493_v26 = vadd.f32 %v1492_v24, %v1467_v23 }
 0xdef   : > { %v1497_v27 = vmul.f32 0.70710677, %v1493_v26  ;;  %v1496_v7 = vmul.f32 0.5, %v1493_v26 }
 0xdf1   : > { %v1498_v30 = vmul.f32 %v1497_v27, %v1497_v27 }
 0xdf3   : > { %v1499_v31 = vmin.f32 %v1498_v30, 16.0 }
 0xdf4   : > { %v1494_v33 = vpop.f32.mrf.mxu3 }
 0xdf5   : > { %v1500_v45 = vmul.f32 2.1237322e-06, %v1499_v31  ;;  %v1511_v35 = vmul.f32 3.8918573e-05, %v1499_v31 }
 0xdf7   : > { %v1501_v36 = vadd.f32 0.00028619796, %v1500_v45  ;;  %v1512_v3 = vadd.f32 0.001143296, %v1511_v35 }
 0xdf9   : > { %v1502_v38 = vmul.f32 %v1501_v36, %v1499_v31  ;;  %v1513_v39 = vmul.f32 %v1512_v3, %v1499_v31 }
 0xdfb   : > { %v1514_v40 = vadd.f32 0.014752088, %v1513_v39  ;;  %v1503_v41 = vadd.f32 0.0036580483, %v1502_v38 }
 0xdfd   : > { %v1515_v43 = vmul.f32 %v1514_v40, %v1499_v31  ;;  %v1504_v47 = vmul.f32 %v1503_v41, %v1499_v31 }
 0xdff   : > { %v1516_v44 = vadd.f32 0.112945676, %v1515_v43  ;;  %v1505_v51 = vadd.f32 0.05243302, %v1504_v47 }
 0xe01   : > { %v1517_v49 = vmul.f32 %v1516_v44, %v1499_v31  ;;  %v1506_v32 = vmul.f32 %v1505_v51, %v1499_v31 }
 0xe03   : > { %v1518_v50 = vadd.f32 0.4994258, %v1517_v49  ;;  %v1507_v28 = vadd.f32 0.18741608, %v1506_v32 }
 0xe05   : > { %v1519_v52 = vmul.f32 %v1518_v50, %v1499_v31  ;;  %v1508_v55 = vmul.f32 %v1507_v28, %v1499_v31 }
 0xe07   : > { %v1520_v53 = vadd.f32 1.0, %v1519_v52  ;;  %v1509_v59 = vadd.f32 1.1283791, %v1508_v55 }
 0xe09   : > { %2185 = vrcp.f32 %v1520_v53  ;;  %v1532_v58 = vand.u32 2147483648, %v1520_v53  ;;  %v1530_v62 = vand.u32 2147483647, %v1520_v53  ;;  %vm1526_vm8 = vweird.f32 %v1520_v53 }
 0xe0a   : > { %v1510_v1 = vmul.f32 %v1509_v59, %v1497_v27 }
 0xe0b   : > { %v1533_v0 = vor.u32 1.1754944e-38, %v1532_v58  ;;  %vm1531_vm10 = vcmp.eq.f32.partialorder %v1530_v62, 8.507059e+37 }
 0xe0f   : > { %v2186_v54 = vpop.eup %2185 }
 0xe10   : > { %v1522_v56 = vmul.f32 %v2186_v54, %v1520_v53  ;;  %vm1527_vm7 = vweird.f32 %v2186_v54 }
 0xe11   : > { %vm1528_vm9 = vmor %vm1526_vm8, %vm1527_vm7 }
 0xe12   : > { %v1523_v57 = vsub.f32 1.0, %v1522_v56 }
 0xe14   : > { %v1524_v60 = vmul.f32 %v2186_v54, %v1523_v57 }
 0xe16   : > { %v1525_v63 = vadd.f32 %v2186_v54, %v1524_v60 }
 0xe18   : > { %v1529_v4 = vsel %vm1528_vm9, %v2186_v54, %v1525_v63 }
 0xe19   : > { %v1534_v5 = vsel %vm1531_vm10, %v1533_v0, %v1529_v4 }
 0xe1a   : > { %v1535_v6 = vmul.f32 %v1534_v5, %v1510_v1 }
 0xe1c   : > { %v2011_v46 = vclamps-f32 %v1535_v6, 1.0 }
 0xe1e   : > { %v1538_v8 = vadd.f32 1.0, %v2011_v46 }
 0xe20   : > { %v1539_v9 = vmul.f32 %v1538_v8, %v1496_v7 }
 0xe22   : > { %v1540_v10 = vpack.c.bf16 %v1539_v9, %v1539_v9 }
 0xe24   : > { %1615 = vmatmul.bf16.vlgmr.msra.gmra.mxu0 %v1540_v10 }
 0xea1   : > { %v1616_v13 = vpop.f32.mrf.mxu0 }
 0xea2   : > { %v1617_v14 = vadd.f32 %v1616_v13, %v1558_v11 }
 0xea4   : > { %v1620_v15 = vadd.f32 %v1617_v14, %v2558_v61  ;;  %v2139_v61 = vld [vmem:[%s2631_s9] sm:$0xff] }
 0xea5   : > { %1674 = vmatpush.bf16.msra.mxu1 %v2139_v61 }
 0xea6   : > { %v1621_v16 = vsel %vm796_vm0, %v1620_v15, 0.0 }
 0xea7   : > { %1622 = vadd.xlane.f32.xlu0 %v1621_v16 }
 0xea9   : > { %v1618_v17 = vpop.f32.mrf.mxu0 }
 0xf1a   : > { %v1623_v18 = vpop.xlane.xlu0 %1622 }
 0xf1b   : > { %v1624_v19 = vmul.f32 %v1623_v18, %v2413_v12 }
 0xf1d   : > { %v1625_v20 = vsub.f32 %v1620_v15, %v1624_v19 }
 0xf1f   : > { %v1626_v21 = vmul.f32 %v1625_v20, %v1625_v20 }
 0xf21   : > { %v1627_v22 = vsel %vm796_vm0, %v1626_v21, 0.0 }
 0xf22   : > { %1628 = vadd.xlane.f32.xlu0 %v1627_v22 }
 0xf95   : > { %v1629_v23 = vpop.xlane.xlu0 %1628 }
 0xf96   : > { %v1630_v24 = vmul.f32 %v1629_v23, %v2413_v12  ;;  %v2156_v12 = vld [vmem:[%s2632_s10] ss:$0 sm:$0xff] }
 0xf98   : > { %v1631_v25 = vadd.f32 1e-06, %v1630_v24 }
 0xf9a   : > { %2187 = vrsqrt.f32 %v1631_v25  ;;  %vm1638_vm12 = vweird.f32 %v1631_v25 }
 0xfa0   : > { %v2188_v26 = vpop.eup %2187 }
 0xfa1   : > { %v1633_v27 = vmul.f32 %v2188_v26, %v1631_v25  ;;  %vm1639_vm11 = vweird.f32 %v2188_v26 }
 0xfa2   : > { %vm1640_vm13 = vmor %vm1638_vm12, %vm1639_vm11 }
 0xfa3   : > { %v1634_v29 = vmul.f32 %v2188_v26, %v1633_v27 }
 0xfa5   : > { %v1635_v30 = vmul.f32 0.5, %v1634_v29 }
 0xfa7   : > { %v1636_v31 = vsub.f32 1.5, %v1635_v30 }
 0xfa9   : > { %v1637_v33 = vmul.f32 %v2188_v26, %v1636_v31 }
 0xfab   : > { %v1641_v34 = vsel %vm1640_vm13, %v2188_v26, %v1637_v33 }
 0xfac   : > { %v1642_v45 = vmul.f32 %v1641_v34, %v1625_v20 }
 0xfae   : > { %v1643_v35 = vpack.c.bf16 %v1642_v45, %v1642_v45 }
 0xfb0   : > { %2068 = vmatmul.msk.bf16.vlgmr.msra.gmra.mxu1 %vm796_vm0, %v1643_v35 }
0x102d   : > { %v1676_v36 = vpop.f32.mrf.mxu1 }
0x102e   : > { %v1677_v3 = vadd.f32 %v2156_v12, %v1676_v36 }
0x1030   : > { %1680 = vst.msk [vmem:[%s384_s22] sm:$0xff] %vm870_vm5, %v1677_v3 }
0x1035   : > { %v1678_v37 = vpop.f32.mrf.mxu1 }
0x1036 PF: > { %s21_s17 = sadd.s32 1, %s2195_s17  }
0x1037   : > { %p18_p4 = scmp.ge.s32.totalorder %s21_s17, 4  }
0x1039   :  { %20 = sbr.rel (!%p18_p4) target bundleno = 1 (0x1), region = 99 }

</bundles_post_ra>
